<compile_context>
chip_gen: v7x
topology: tpu7x:2x2x1
jax: 0.10.0
libtpu: 0.0.40
codegen_flags: <defaults>
</compile_context>

<pallas_src>
import math
import functools

import numpy as np
import jax
import jax.numpy as jnp
from jax.experimental import pallas as pl
from jax.experimental.pallas import tpu as pltpu

_EPS = 1.1920929e-07          # torch.finfo(float32).eps (torch RMSNorm default)
_NEG_INF = -1e30


def _rmsnorm(x, g):
    ms = jnp.mean(x * x, axis=-1, keepdims=True)
    return x * jax.lax.rsqrt(ms + _EPS) * g


def _gelu_exact(x):
    # torch nn.GELU() default is the exact erf form
    return 0.5 * x * (1.0 + jax.lax.erf(x * (1.0 / math.sqrt(2.0))))


def _bf16(x):
    return x.astype(jnp.bfloat16)


def dca_block_kernel(
    tok_ref,                 # (Y, N, D) f32   tokens across depth (batch squeezed)
    g_agg_ref,               # (1, D)    f32   GRN RMSNorm weight
    w_agg_t_ref,             # (D, 3)    bf16  GRN aggregate Linear weight (transposed)
    b_grn_ref,               # (3, Y)    f32   GRN bias, in SMEM (scalar reads)
    g_q_ref, w_q_ref,        # (1, D) f32, (D, H*Dh) bf16
    g_k_ref, w_k_ref,
    g_v_ref, w_v_ref,
    cos_ref, sin_ref,        # (N, Dh) f32 rotary tables (half-split; sin sign folded)
    w_o_ref,                 # (H*Dh, D) bf16
    g_ff_ref,                # (1, D)    f32   pre-FF RMSNorm weight
    w1_ref, b1_ref,          # (D, F) bf16, (1, F) f32
    w2_ref, b2_ref,          # (F, D) bf16, (1, D) f32
    out_ref,                 # (N, D) f32
    *, heads, dim_head, q_chunk,
):
    f32 = jnp.float32
    x = tok_ref[...].astype(f32)                       # (Y, N, D)
    Y, N, D = x.shape
    H, Dh = heads, dim_head
    half = Dh // 2

    # ------------- GRN: gated aggregation across depth -------------
    # Gate scores: one MXU matmul over the whole (Y*N, D) slab (bf16 in, f32 acc).
    xn = _rmsnorm(x, g_agg_ref[...])                   # (Y, N, D) f32
    scores = jnp.dot(_bf16(xn.reshape(Y * N, D)), w_agg_t_ref[...],
                     preferred_element_type=f32)       # (Y*N, 3)
    scores = scores.reshape(Y, N, 3)

    def grn_output(o):
        acc = None
        for y in range(Y):                             # Y is small & static
            gate = jnp.maximum(scores[y, :, o:o + 1] + b_grn_ref[o, y], 0.0)
            term = x[y] * gate                         # (N, D) f32 on the VPU
            acc = term if acc is None else acc + term
        return acc

    q_in, k_in, v_in = grn_output(0), grn_output(1), grn_output(2)
    residual = q_in

    # ------------- Attention: RMSNorm + projections + rotary -------------
    # Single lane-dense (N, D) @ (D, H*Dh) matmul per projection, bf16 / f32 acc.
    q_all = jnp.dot(_bf16(_rmsnorm(q_in, g_q_ref[...])), w_q_ref[...],
                    preferred_element_type=f32)        # (N, H*Dh)
    k_all = jnp.dot(_bf16(_rmsnorm(k_in, g_k_ref[...])), w_k_ref[...],
                    preferred_element_type=f32)
    v_all = jnp.dot(_bf16(_rmsnorm(v_in, g_v_ref[...])), w_v_ref[...],
                    preferred_element_type=f32)

    def split_heads(t):                                # (N, H*Dh) -> (H, N, Dh)
        return jnp.stack([t[:, h * Dh:(h + 1) * Dh] for h in range(H)], axis=0)

    cos = cos_ref[...]                                 # (N, Dh), broadcasts over H
    sin = sin_ref[...]                                 # sign of rotated half folded in

    def rope(t):                                       # (H, N, Dh)
        # TODO(synk): switch the half-swap to pltpu.roll(t, half, axis=-1) once
        # dim_head spans full lanes (>=128); at Dh=8 the concat is the safe form.
        rot = jnp.concatenate([t[..., half:], t[..., :half]], axis=-1)
        return t * cos + rot * sin

    scale = 1.0 / math.sqrt(Dh)
    q3 = rope(split_heads(q_all)) * scale              # (H, N, Dh) f32
    k3_b = _bf16(rope(split_heads(k_all)))             # (H, N, Dh) bf16
    v3_b = _bf16(split_heads(v_all))

    w_o = w_o_ref[...]
    g_ff = g_ff_ref[...]
    w1, b1 = w1_ref[...], b1_ref[...]
    w2, b2 = w2_ref[...], b2_ref[...]

    # ------------- Query-chunked causal attention + FFN -------------
    # Bounds the live score tensor to (H, TQ, kv) and the FFN hidden to (TQ, F);
    # keys beyond a chunk's end never attend (causal), so the KV slice is static.
    for q0 in range(0, N, q_chunk):
        tq = min(q_chunk, N - q0)
        kv = q0 + tq

        qc = _bf16(q3[:, q0:q0 + tq, :])               # (H, tq, Dh)
        kc = k3_b[:, :kv, :]                           # (H, kv, Dh)
        vc = v3_b[:, :kv, :]

        s = jnp.einsum('hqd,hkd->hqk', qc, kc,
                       preferred_element_type=f32)     # (H, tq, kv)
        row = q0 + jax.lax.broadcasted_iota(jnp.int32, (tq, kv), 0)
        col = jax.lax.broadcasted_iota(jnp.int32, (tq, kv), 1)
        s = jnp.where(row >= col, s, _NEG_INF)

        s = s - jnp.max(s, axis=-1, keepdims=True)
        p = jnp.exp(s)
        p = p * pl.reciprocal(jnp.sum(p, axis=-1, keepdims=True), approx=True)

        o3 = jnp.einsum('hqk,hkd->hqd', _bf16(p), vc,
                        preferred_element_type=f32)    # (H, tq, Dh)
        merged = jnp.concatenate([o3[h] for h in range(H)], axis=-1)  # (tq, H*Dh)
        attn = jnp.dot(_bf16(merged), w_o, preferred_element_type=f32)  # (tq, D)

        # ---------------- FeedForward ----------------
        ff_in = _rmsnorm(attn + residual[q0:q0 + tq, :], g_ff)
        h1 = jnp.dot(_bf16(ff_in), w1, preferred_element_type=f32) + b1
        h1 = _gelu_exact(h1)
        ff = jnp.dot(_bf16(h1), w2, preferred_element_type=f32) + b2

        # Matches the PyTorch module exactly: return ff_out + attn_out
        out_ref[q0:q0 + tq, :] = (ff + attn).astype(out_ref.dtype)


def dca_block(tokens, params, *, heads, dim_head, q_chunk=128):
    Y, B, N, D = tokens.shape
    q_chunk = max(1, min(q_chunk, N))
    bf16 = jnp.bfloat16

    # Pre-cast matmul weights to bf16 in the wrapper (halves weight DMA bytes);
    # RMSNorm weights / biases / rotary tables stay f32 for f32 elementwise math.
    wargs = (
        params["g_agg"],
        params["w_agg"].T.astype(bf16),                # (D, 3)
        params["b_grn"],                               # (3, Y) -> SMEM scalars
        params["g_q"], params["w_q"].astype(bf16),
        params["g_k"], params["w_k"].astype(bf16),
        params["g_v"], params["w_v"].astype(bf16),
        params["cos"], params["sin"],
        params["w_o"].astype(bf16),
        params["g_ff"],
        params["w1"].astype(bf16), params["b1"],
        params["w2"].astype(bf16), params["b2"],
    )

    def full_vmem(a):
        nd = a.ndim
        return pl.BlockSpec(a.shape, lambda b, nd=nd: (0,) * nd)

    in_specs = [pl.BlockSpec((Y, None, N, D), lambda b: (0, b, 0, 0))]
    for i, a in enumerate(wargs):
        if i == 2:  # b_grn: tiny per-(output, layer) bias -> SMEM
            in_specs.append(pl.BlockSpec(memory_space=pltpu.MemorySpace.SMEM))
        else:
            in_specs.append(full_vmem(a))

    kernel = functools.partial(dca_block_kernel, heads=heads, dim_head=dim_head,
                               q_chunk=q_chunk)
    # TODO(synk): for very long N, hoist GRN + K/V projection into a first pass
    # and stream K/V from HBM flash-style; here full-sequence K/V stays in VMEM.
    return pl.pallas_call(
        kernel,
        out_shape=jax.ShapeDtypeStruct((B, N, D), jnp.float32),
        grid_spec=pltpu.PrefetchScalarGridSpec(
            num_scalar_prefetch=0,
            grid=(B,),
            in_specs=in_specs,
            out_specs=pl.BlockSpec((None, N, D), lambda b: (b, 0, 0)),
        ),
        compiler_params=pltpu.CompilerParams(
            dimension_semantics=("parallel",),
            vmem_limit_bytes=32 * 1024 * 1024,
        ),
    )(tokens, *wargs)


def make_params(key, *, dim, grn_num_layers, heads, dim_head, seq_len,
                ff_expansion=4.0):
    dim_inner = heads * dim_head
    dim_ff = int(dim * ff_expansion)
    ks = jax.random.split(key, 10)

    def rnd(k, shape, scale):
        return jax.random.normal(k, shape, jnp.float32) * scale

    # GRN aggregate Linear (torch inits this to zeros with bias[:, -1] = 1; we
    # add small deterministic noise so the aggregation path is exercised).
    w_agg = rnd(ks[0], (3, dim), 0.2)
    b_grn = jnp.zeros((3, grn_num_layers), jnp.float32).at[:, -1].set(1.0)
    b_grn = b_grn + rnd(ks[1], (3, grn_num_layers), 0.1)

    w_q = rnd(ks[2], (dim, dim_inner), dim ** -0.5)
    w_k = rnd(ks[3], (dim, dim_inner), dim ** -0.5)
    w_v = rnd(ks[4], (dim, dim_inner), dim ** -0.5)

    # torch RotaryEmbedding rotates interleaved (even/odd) pairs.  Permuting the
    # per-head q/k projection columns to a half-split layout keeps q.k scores
    # identical while letting the kernel use the cheap "swap halves" rotation.
    perm = np.concatenate([np.arange(0, dim_head, 2), np.arange(1, dim_head, 2)])
    full_perm = np.concatenate([perm + h * dim_head for h in range(heads)])
    w_q = w_q[:, full_perm]
    w_k = w_k[:, full_perm]

    w_o = rnd(ks[5], (dim_inner, dim), dim_inner ** -0.5)
    w1 = rnd(ks[6], (dim, dim_ff), dim ** -0.5)
    b1 = rnd(ks[7], (1, dim_ff), 0.02)
    w2 = rnd(ks[8], (dim_ff, dim), dim_ff ** -0.5)
    b2 = rnd(ks[9], (1, dim), 0.02)

    # Rotary tables in half-split layout; the sign of the rotated half is folded
    # into the sin table:  rope(t) = t * cos + swap_halves(t) * sin_signed.
    freqs = 1.0 / (10000.0 ** (np.arange(0, dim_head, 2, dtype=np.float32) / dim_head))
    ang = np.arange(seq_len, dtype=np.float32)[:, None] * freqs[None, :]
    cos = jnp.asarray(np.concatenate([np.cos(ang), np.cos(ang)], -1), jnp.float32)
    sin = jnp.asarray(np.concatenate([-np.sin(ang), np.sin(ang)], -1), jnp.float32)

    ones = lambda: jnp.ones((1, dim), jnp.float32)   # torch RMSNorm weight init
    return dict(g_agg=ones(), w_agg=w_agg, b_grn=b_grn,
                g_q=ones(), w_q=w_q, g_k=ones(), w_k=w_k,
                g_v=ones(), w_v=w_v, cos=cos, sin=sin,
                w_o=w_o, g_ff=ones(), w1=w1, b1=b1, w2=w2, b2=b2)


if __name__ == "__main__":
    Y, B, N, D = 3, 2, 8, 32          # grn_num_layers, batch, seq, dim
    heads, dim_head = 4, 8            # dim_inner = 32, ff hidden = 128

    key = jax.random.PRNGKey(0)
    k_tok, k_par = jax.random.split(key)
    tokens = jax.random.normal(k_tok, (Y, B, N, D), jnp.float32)
    params = make_params(k_par, dim=D, grn_num_layers=Y, heads=heads,
                         dim_head=dim_head, seq_len=N)

    out = dca_block(tokens, params, heads=heads, dim_head=dim_head)
    jax.block_until_ready(out)
    assert out.shape == (B, N, D) and out.dtype == jnp.float32
    print("KERNEL_OK")
</pallas_src>

<mosaic_0001>
module attributes {stable_mosaic.version = 11 : i64} {
  func.func @dca_block_kernel(%arg0: i32, %arg1: memref<3x1x8x32xf32, #tpu.memory_space<vmem>>, %arg2: memref<1x32xf32, #tpu.memory_space<vmem>>, %arg3: memref<32x3xbf16, #tpu.memory_space<vmem>>, %arg4: memref<3x3xf32, #tpu.memory_space<smem>>, %arg5: memref<1x32xf32, #tpu.memory_space<vmem>>, %arg6: memref<32x32xbf16, #tpu.memory_space<vmem>>, %arg7: memref<1x32xf32, #tpu.memory_space<vmem>>, %arg8: memref<32x32xbf16, #tpu.memory_space<vmem>>, %arg9: memref<1x32xf32, #tpu.memory_space<vmem>>, %arg10: memref<32x32xbf16, #tpu.memory_space<vmem>>, %arg11: memref<8x8xf32, #tpu.memory_space<vmem>>, %arg12: memref<8x8xf32, #tpu.memory_space<vmem>>, %arg13: memref<32x32xbf16, #tpu.memory_space<vmem>>, %arg14: memref<1x32xf32, #tpu.memory_space<vmem>>, %arg15: memref<32x128xbf16, #tpu.memory_space<vmem>>, %arg16: memref<1x128xf32, #tpu.memory_space<vmem>>, %arg17: memref<128x32xbf16, #tpu.memory_space<vmem>>, %arg18: memref<1x32xf32, #tpu.memory_space<vmem>>, %arg19: memref<1x8x32xf32, #tpu.memory_space<vmem>>) attributes {dimension_semantics = [#tpu.dimension_semantics<parallel>], iteration_bounds = array<i64: 2>, scalar_prefetch = 0 : i64, scratch_operands = 0 : i64, tpu.core_type = #tpu.core_type<tc>, window_params = [{transform_indices = @transform_0, window_bounds = array<i64: 3, 1, 8, 32>}, {pipeline_mode = #tpu.pipeline_mode<synchronous>, transform_indices = @transform_1, window_bounds = array<i64: 1, 32>}, {pipeline_mode = #tpu.pipeline_mode<synchronous>, transform_indices = @transform_2, window_bounds = array<i64: 32, 3>}, {transform_indices = @transform_3, window_bounds = array<i64: 3, 3>}, {pipeline_mode = #tpu.pipeline_mode<synchronous>, transform_indices = @transform_4, window_bounds = array<i64: 1, 32>}, {pipeline_mode = #tpu.pipeline_mode<synchronous>, transform_indices = @transform_5, window_bounds = array<i64: 32, 32>}, {pipeline_mode = #tpu.pipeline_mode<synchronous>, transform_indices = @transform_6, window_bounds = array<i64: 1, 32>}, {pipeline_mode = #tpu.pipeline_mode<synchronous>, transform_indices = @transform_7, window_bounds = array<i64: 32, 32>}, {pipeline_mode = #tpu.pipeline_mode<synchronous>, transform_indices = @transform_8, window_bounds = array<i64: 1, 32>}, {pipeline_mode = #tpu.pipeline_mode<synchronous>, transform_indices = @transform_9, window_bounds = array<i64: 32, 32>}, {pipeline_mode = #tpu.pipeline_mode<synchronous>, transform_indices = @transform_10, window_bounds = array<i64: 8, 8>}, {pipeline_mode = #tpu.pipeline_mode<synchronous>, transform_indices = @transform_11, window_bounds = array<i64: 8, 8>}, {pipeline_mode = #tpu.pipeline_mode<synchronous>, transform_indices = @transform_12, window_bounds = array<i64: 32, 32>}, {pipeline_mode = #tpu.pipeline_mode<synchronous>, transform_indices = @transform_13, window_bounds = array<i64: 1, 32>}, {pipeline_mode = #tpu.pipeline_mode<synchronous>, transform_indices = @transform_14, window_bounds = array<i64: 32, 128>}, {pipeline_mode = #tpu.pipeline_mode<synchronous>, transform_indices = @transform_15, window_bounds = array<i64: 1, 128>}, {pipeline_mode = #tpu.pipeline_mode<synchronous>, transform_indices = @transform_16, window_bounds = array<i64: 128, 32>}, {pipeline_mode = #tpu.pipeline_mode<synchronous>, transform_indices = @transform_17, window_bounds = array<i64: 1, 32>}, {transform_indices = @transform_18, window_bounds = array<i64: 1, 8, 32>}]} {
    %c0 = arith.constant 0 : index
    %c0_0 = arith.constant 0 : index
    %c0_1 = arith.constant 0 : index
    %c0_2 = arith.constant 0 : index
    %0 = vector.load %arg1[%c0, %c0_0, %c0_1, %c0_2] : memref<3x1x8x32xf32, #tpu.memory_space<vmem>>, vector<3x1x8x32xf32>
    %1 = vector.shape_cast %0 : vector<3x1x8x32xf32> to vector<3x8x32xf32>
    %c0_3 = arith.constant 0 : index
    %c0_4 = arith.constant 0 : index
    %2 = vector.load %arg2[%c0_3, %c0_4] : memref<1x32xf32, #tpu.memory_space<vmem>>, vector<1x32xf32>
    %3 = arith.mulf %1, %1 : vector<3x8x32xf32>
    %cst = arith.constant dense<0.000000e+00> : vector<3x8xf32>
    %4 = vector.multi_reduction <add>, %3, %cst [2] : vector<3x8x32xf32> to vector<3x8xf32>
    %5 = vector.shape_cast %4 : vector<3x8xf32> to vector<3x8x1xf32>
    %cst_5 = arith.constant 3.200000e+01 : f32
    %6 = vector.broadcast %cst_5 : f32 to vector<3x8x1xf32>
    %7 = arith.divf %5, %6 : vector<3x8x1xf32>
    %cst_6 = arith.constant 1.1920929E-7 : f32
    %8 = vector.broadcast %cst_6 : f32 to vector<3x8x1xf32>
    %9 = arith.addf %7, %8 : vector<3x8x1xf32>
    %10 = math.rsqrt %9 : vector<3x8x1xf32>
    %11 = vector.broadcast %10 : vector<3x8x1xf32> to vector<3x8x32xf32>
    %12 = arith.mulf %1, %11 : vector<3x8x32xf32>
    %13 = vector.shape_cast %2 : vector<1x32xf32> to vector<1x1x32xf32>
    %14 = vector.broadcast %13 : vector<1x1x32xf32> to vector<3x8x32xf32>
    %15 = arith.mulf %12, %14 : vector<3x8x32xf32>
    %16 = vector.shape_cast %15 : vector<3x8x32xf32> to vector<24x32xf32>
    %17 = arith.truncf %16 : vector<24x32xf32> to vector<24x32xbf16>
    %c0_7 = arith.constant 0 : index
    %c0_8 = arith.constant 0 : index
    %18 = vector.load %arg3[%c0_7, %c0_8] : memref<32x3xbf16, #tpu.memory_space<vmem>>, vector<32x3xbf16>
    %cst_9 = arith.constant dense<0.000000e+00> : vector<24x3xf32>
    %19 = tpu.matmul %17, %18, %cst_9 {dimension_numbers = #tpu.dot_dimension_numbers<[1], [0], [0], [1], [0, 0, 1, 1], [], []>} : vector<24x32xbf16>, vector<32x3xbf16>, vector<24x3xf32> -> vector<24x3xf32>
    %20 = vector.shape_cast %19 : vector<24x3xf32> to vector<3x8x3xf32>
    %21 = vector.extract_strided_slice %20 {offsets = [0, 0, 0], sizes = [1, 8, 1], strides = [1, 1, 1]} : vector<3x8x3xf32> to vector<1x8x1xf32>
    %22 = vector.shape_cast %21 : vector<1x8x1xf32> to vector<8x1xf32>
    %c0_10 = arith.constant 0 : index
    %c0_11 = arith.constant 0 : index
    %23 = memref.load %arg4[%c0_10, %c0_11] : memref<3x3xf32, #tpu.memory_space<smem>>
    %24 = vector.broadcast %23 : f32 to vector<8x1xf32>
    %25 = arith.addf %22, %24 : vector<8x1xf32>
    %cst_12 = arith.constant 0.000000e+00 : f32
    %26 = vector.broadcast %cst_12 : f32 to vector<8x1xf32>
    %27 = arith.maximumf %25, %26 : vector<8x1xf32>
    %28 = vector.extract_strided_slice %1 {offsets = [0, 0, 0], sizes = [1, 8, 32], strides = [1, 1, 1]} : vector<3x8x32xf32> to vector<1x8x32xf32>
    %29 = vector.shape_cast %28 : vector<1x8x32xf32> to vector<8x32xf32>
    %30 = vector.broadcast %27 : vector<8x1xf32> to vector<8x32xf32>
    %31 = arith.mulf %29, %30 : vector<8x32xf32>
    %32 = vector.extract_strided_slice %20 {offsets = [1, 0, 0], sizes = [1, 8, 1], strides = [1, 1, 1]} : vector<3x8x3xf32> to vector<1x8x1xf32>
    %33 = vector.shape_cast %32 : vector<1x8x1xf32> to vector<8x1xf32>
    %c0_13 = arith.constant 0 : index
    %c1 = arith.constant 1 : index
    %34 = memref.load %arg4[%c0_13, %c1] : memref<3x3xf32, #tpu.memory_space<smem>>
    %35 = vector.broadcast %34 : f32 to vector<8x1xf32>
    %36 = arith.addf %33, %35 : vector<8x1xf32>
    %cst_14 = arith.constant 0.000000e+00 : f32
    %37 = vector.broadcast %cst_14 : f32 to vector<8x1xf32>
    %38 = arith.maximumf %36, %37 : vector<8x1xf32>
    %39 = vector.extract_strided_slice %1 {offsets = [1, 0, 0], sizes = [1, 8, 32], strides = [1, 1, 1]} : vector<3x8x32xf32> to vector<1x8x32xf32>
    %40 = vector.shape_cast %39 : vector<1x8x32xf32> to vector<8x32xf32>
    %41 = vector.broadcast %38 : vector<8x1xf32> to vector<8x32xf32>
    %42 = arith.mulf %40, %41 : vector<8x32xf32>
    %43 = arith.addf %31, %42 : vector<8x32xf32>
    %44 = vector.extract_strided_slice %20 {offsets = [2, 0, 0], sizes = [1, 8, 1], strides = [1, 1, 1]} : vector<3x8x3xf32> to vector<1x8x1xf32>
    %45 = vector.shape_cast %44 : vector<1x8x1xf32> to vector<8x1xf32>
    %c0_15 = arith.constant 0 : index
    %c2 = arith.constant 2 : index
    %46 = memref.load %arg4[%c0_15, %c2] : memref<3x3xf32, #tpu.memory_space<smem>>
    %47 = vector.broadcast %46 : f32 to vector<8x1xf32>
    %48 = arith.addf %45, %47 : vector<8x1xf32>
    %cst_16 = arith.constant 0.000000e+00 : f32
    %49 = vector.broadcast %cst_16 : f32 to vector<8x1xf32>
    %50 = arith.maximumf %48, %49 : vector<8x1xf32>
    %51 = vector.extract_strided_slice %1 {offsets = [2, 0, 0], sizes = [1, 8, 32], strides = [1, 1, 1]} : vector<3x8x32xf32> to vector<1x8x32xf32>
    %52 = vector.shape_cast %51 : vector<1x8x32xf32> to vector<8x32xf32>
    %53 = vector.broadcast %50 : vector<8x1xf32> to vector<8x32xf32>
    %54 = arith.mulf %52, %53 : vector<8x32xf32>
    %55 = arith.addf %43, %54 : vector<8x32xf32>
    %56 = vector.extract_strided_slice %20 {offsets = [0, 0, 1], sizes = [1, 8, 1], strides = [1, 1, 1]} : vector<3x8x3xf32> to vector<1x8x1xf32>
    %57 = vector.shape_cast %56 : vector<1x8x1xf32> to vector<8x1xf32>
    %c1_17 = arith.constant 1 : index
    %c0_18 = arith.constant 0 : index
    %58 = memref.load %arg4[%c1_17, %c0_18] : memref<3x3xf32, #tpu.memory_space<smem>>
    %59 = vector.broadcast %58 : f32 to vector<8x1xf32>
    %60 = arith.addf %57, %59 : vector<8x1xf32>
    %cst_19 = arith.constant 0.000000e+00 : f32
    %61 = vector.broadcast %cst_19 : f32 to vector<8x1xf32>
    %62 = arith.maximumf %60, %61 : vector<8x1xf32>
    %63 = vector.extract_strided_slice %1 {offsets = [0, 0, 0], sizes = [1, 8, 32], strides = [1, 1, 1]} : vector<3x8x32xf32> to vector<1x8x32xf32>
    %64 = vector.shape_cast %63 : vector<1x8x32xf32> to vector<8x32xf32>
    %65 = vector.broadcast %62 : vector<8x1xf32> to vector<8x32xf32>
    %66 = arith.mulf %64, %65 : vector<8x32xf32>
    %67 = vector.extract_strided_slice %20 {offsets = [1, 0, 1], sizes = [1, 8, 1], strides = [1, 1, 1]} : vector<3x8x3xf32> to vector<1x8x1xf32>
    %68 = vector.shape_cast %67 : vector<1x8x1xf32> to vector<8x1xf32>
    %c1_20 = arith.constant 1 : index
    %c1_21 = arith.constant 1 : index
    %69 = memref.load %arg4[%c1_20, %c1_21] : memref<3x3xf32, #tpu.memory_space<smem>>
    %70 = vector.broadcast %69 : f32 to vector<8x1xf32>
    %71 = arith.addf %68, %70 : vector<8x1xf32>
    %cst_22 = arith.constant 0.000000e+00 : f32
    %72 = vector.broadcast %cst_22 : f32 to vector<8x1xf32>
    %73 = arith.maximumf %71, %72 : vector<8x1xf32>
    %74 = vector.extract_strided_slice %1 {offsets = [1, 0, 0], sizes = [1, 8, 32], strides = [1, 1, 1]} : vector<3x8x32xf32> to vector<1x8x32xf32>
    %75 = vector.shape_cast %74 : vector<1x8x32xf32> to vector<8x32xf32>
    %76 = vector.broadcast %73 : vector<8x1xf32> to vector<8x32xf32>
    %77 = arith.mulf %75, %76 : vector<8x32xf32>
    %78 = arith.addf %66, %77 : vector<8x32xf32>
    %79 = vector.extract_strided_slice %20 {offsets = [2, 0, 1], sizes = [1, 8, 1], strides = [1, 1, 1]} : vector<3x8x3xf32> to vector<1x8x1xf32>
    %80 = vector.shape_cast %79 : vector<1x8x1xf32> to vector<8x1xf32>
    %c1_23 = arith.constant 1 : index
    %c2_24 = arith.constant 2 : index
    %81 = memref.load %arg4[%c1_23, %c2_24] : memref<3x3xf32, #tpu.memory_space<smem>>
    %82 = vector.broadcast %81 : f32 to vector<8x1xf32>
    %83 = arith.addf %80, %82 : vector<8x1xf32>
    %cst_25 = arith.constant 0.000000e+00 : f32
    %84 = vector.broadcast %cst_25 : f32 to vector<8x1xf32>
    %85 = arith.maximumf %83, %84 : vector<8x1xf32>
    %86 = vector.extract_strided_slice %1 {offsets = [2, 0, 0], sizes = [1, 8, 32], strides = [1, 1, 1]} : vector<3x8x32xf32> to vector<1x8x32xf32>
    %87 = vector.shape_cast %86 : vector<1x8x32xf32> to vector<8x32xf32>
    %88 = vector.broadcast %85 : vector<8x1xf32> to vector<8x32xf32>
    %89 = arith.mulf %87, %88 : vector<8x32xf32>
    %90 = arith.addf %78, %89 : vector<8x32xf32>
    %91 = vector.extract_strided_slice %20 {offsets = [0, 0, 2], sizes = [1, 8, 1], strides = [1, 1, 1]} : vector<3x8x3xf32> to vector<1x8x1xf32>
    %92 = vector.shape_cast %91 : vector<1x8x1xf32> to vector<8x1xf32>
    %c2_26 = arith.constant 2 : index
    %c0_27 = arith.constant 0 : index
    %93 = memref.load %arg4[%c2_26, %c0_27] : memref<3x3xf32, #tpu.memory_space<smem>>
    %94 = vector.broadcast %93 : f32 to vector<8x1xf32>
    %95 = arith.addf %92, %94 : vector<8x1xf32>
    %cst_28 = arith.constant 0.000000e+00 : f32
    %96 = vector.broadcast %cst_28 : f32 to vector<8x1xf32>
    %97 = arith.maximumf %95, %96 : vector<8x1xf32>
    %98 = vector.extract_strided_slice %1 {offsets = [0, 0, 0], sizes = [1, 8, 32], strides = [1, 1, 1]} : vector<3x8x32xf32> to vector<1x8x32xf32>
    %99 = vector.shape_cast %98 : vector<1x8x32xf32> to vector<8x32xf32>
    %100 = vector.broadcast %97 : vector<8x1xf32> to vector<8x32xf32>
    %101 = arith.mulf %99, %100 : vector<8x32xf32>
    %102 = vector.extract_strided_slice %20 {offsets = [1, 0, 2], sizes = [1, 8, 1], strides = [1, 1, 1]} : vector<3x8x3xf32> to vector<1x8x1xf32>
    %103 = vector.shape_cast %102 : vector<1x8x1xf32> to vector<8x1xf32>
    %c2_29 = arith.constant 2 : index
    %c1_30 = arith.constant 1 : index
    %104 = memref.load %arg4[%c2_29, %c1_30] : memref<3x3xf32, #tpu.memory_space<smem>>
    %105 = vector.broadcast %104 : f32 to vector<8x1xf32>
    %106 = arith.addf %103, %105 : vector<8x1xf32>
    %cst_31 = arith.constant 0.000000e+00 : f32
    %107 = vector.broadcast %cst_31 : f32 to vector<8x1xf32>
    %108 = arith.maximumf %106, %107 : vector<8x1xf32>
    %109 = vector.extract_strided_slice %1 {offsets = [1, 0, 0], sizes = [1, 8, 32], strides = [1, 1, 1]} : vector<3x8x32xf32> to vector<1x8x32xf32>
    %110 = vector.shape_cast %109 : vector<1x8x32xf32> to vector<8x32xf32>
    %111 = vector.broadcast %108 : vector<8x1xf32> to vector<8x32xf32>
    %112 = arith.mulf %110, %111 : vector<8x32xf32>
    %113 = arith.addf %101, %112 : vector<8x32xf32>
    %114 = vector.extract_strided_slice %20 {offsets = [2, 0, 2], sizes = [1, 8, 1], strides = [1, 1, 1]} : vector<3x8x3xf32> to vector<1x8x1xf32>
    %115 = vector.shape_cast %114 : vector<1x8x1xf32> to vector<8x1xf32>
    %c2_32 = arith.constant 2 : index
    %c2_33 = arith.constant 2 : index
    %116 = memref.load %arg4[%c2_32, %c2_33] : memref<3x3xf32, #tpu.memory_space<smem>>
    %117 = vector.broadcast %116 : f32 to vector<8x1xf32>
    %118 = arith.addf %115, %117 : vector<8x1xf32>
    %cst_34 = arith.constant 0.000000e+00 : f32
    %119 = vector.broadcast %cst_34 : f32 to vector<8x1xf32>
    %120 = arith.maximumf %118, %119 : vector<8x1xf32>
    %121 = vector.extract_strided_slice %1 {offsets = [2, 0, 0], sizes = [1, 8, 32], strides = [1, 1, 1]} : vector<3x8x32xf32> to vector<1x8x32xf32>
    %122 = vector.shape_cast %121 : vector<1x8x32xf32> to vector<8x32xf32>
    %123 = vector.broadcast %120 : vector<8x1xf32> to vector<8x32xf32>
    %124 = arith.mulf %122, %123 : vector<8x32xf32>
    %125 = arith.addf %113, %124 : vector<8x32xf32>
    %c0_35 = arith.constant 0 : index
    %c0_36 = arith.constant 0 : index
    %126 = vector.load %arg5[%c0_35, %c0_36] : memref<1x32xf32, #tpu.memory_space<vmem>>, vector<1x32xf32>
    %127 = arith.mulf %55, %55 : vector<8x32xf32>
    %cst_37 = arith.constant dense<0.000000e+00> : vector<8xf32>
    %128 = vector.multi_reduction <add>, %127, %cst_37 [1] : vector<8x32xf32> to vector<8xf32>
    %129 = vector.shape_cast %128 : vector<8xf32> to vector<8x1xf32>
    %cst_38 = arith.constant 3.200000e+01 : f32
    %130 = vector.broadcast %cst_38 : f32 to vector<8x1xf32>
    %131 = arith.divf %129, %130 : vector<8x1xf32>
    %cst_39 = arith.constant 1.1920929E-7 : f32
    %132 = vector.broadcast %cst_39 : f32 to vector<8x1xf32>
    %133 = arith.addf %131, %132 : vector<8x1xf32>
    %134 = math.rsqrt %133 : vector<8x1xf32>
    %135 = vector.broadcast %134 : vector<8x1xf32> to vector<8x32xf32>
    %136 = arith.mulf %55, %135 : vector<8x32xf32>
    %137 = vector.broadcast %126 : vector<1x32xf32> to vector<8x32xf32>
    %138 = arith.mulf %136, %137 : vector<8x32xf32>
    %139 = arith.truncf %138 : vector<8x32xf32> to vector<8x32xbf16>
    %c0_40 = arith.constant 0 : index
    %c0_41 = arith.constant 0 : index
    %140 = vector.load %arg6[%c0_40, %c0_41] : memref<32x32xbf16, #tpu.memory_space<vmem>>, vector<32x32xbf16>
    %cst_42 = arith.constant dense<0.000000e+00> : vector<8x32xf32>
    %141 = tpu.matmul %139, %140, %cst_42 {dimension_numbers = #tpu.dot_dimension_numbers<[1], [0], [0], [1], [0, 0, 1, 1], [], []>} : vector<8x32xbf16>, vector<32x32xbf16>, vector<8x32xf32> -> vector<8x32xf32>
    %c0_43 = arith.constant 0 : index
    %c0_44 = arith.constant 0 : index
    %142 = vector.load %arg7[%c0_43, %c0_44] : memref<1x32xf32, #tpu.memory_space<vmem>>, vector<1x32xf32>
    %143 = arith.mulf %90, %90 : vector<8x32xf32>
    %cst_45 = arith.constant dense<0.000000e+00> : vector<8xf32>
    %144 = vector.multi_reduction <add>, %143, %cst_45 [1] : vector<8x32xf32> to vector<8xf32>
    %145 = vector.shape_cast %144 : vector<8xf32> to vector<8x1xf32>
    %cst_46 = arith.constant 3.200000e+01 : f32
    %146 = vector.broadcast %cst_46 : f32 to vector<8x1xf32>
    %147 = arith.divf %145, %146 : vector<8x1xf32>
    %cst_47 = arith.constant 1.1920929E-7 : f32
    %148 = vector.broadcast %cst_47 : f32 to vector<8x1xf32>
    %149 = arith.addf %147, %148 : vector<8x1xf32>
    %150 = math.rsqrt %149 : vector<8x1xf32>
    %151 = vector.broadcast %150 : vector<8x1xf32> to vector<8x32xf32>
    %152 = arith.mulf %90, %151 : vector<8x32xf32>
    %153 = vector.broadcast %142 : vector<1x32xf32> to vector<8x32xf32>
    %154 = arith.mulf %152, %153 : vector<8x32xf32>
    %155 = arith.truncf %154 : vector<8x32xf32> to vector<8x32xbf16>
    %c0_48 = arith.constant 0 : index
    %c0_49 = arith.constant 0 : index
    %156 = vector.load %arg8[%c0_48, %c0_49] : memref<32x32xbf16, #tpu.memory_space<vmem>>, vector<32x32xbf16>
    %cst_50 = arith.constant dense<0.000000e+00> : vector<8x32xf32>
    %157 = tpu.matmul %155, %156, %cst_50 {dimension_numbers = #tpu.dot_dimension_numbers<[1], [0], [0], [1], [0, 0, 1, 1], [], []>} : vector<8x32xbf16>, vector<32x32xbf16>, vector<8x32xf32> -> vector<8x32xf32>
    %c0_51 = arith.constant 0 : index
    %c0_52 = arith.constant 0 : index
    %158 = vector.load %arg9[%c0_51, %c0_52] : memref<1x32xf32, #tpu.memory_space<vmem>>, vector<1x32xf32>
    %159 = arith.mulf %125, %125 : vector<8x32xf32>
    %cst_53 = arith.constant dense<0.000000e+00> : vector<8xf32>
    %160 = vector.multi_reduction <add>, %159, %cst_53 [1] : vector<8x32xf32> to vector<8xf32>
    %161 = vector.shape_cast %160 : vector<8xf32> to vector<8x1xf32>
    %cst_54 = arith.constant 3.200000e+01 : f32
    %162 = vector.broadcast %cst_54 : f32 to vector<8x1xf32>
    %163 = arith.divf %161, %162 : vector<8x1xf32>
    %cst_55 = arith.constant 1.1920929E-7 : f32
    %164 = vector.broadcast %cst_55 : f32 to vector<8x1xf32>
    %165 = arith.addf %163, %164 : vector<8x1xf32>
    %166 = math.rsqrt %165 : vector<8x1xf32>
    %167 = vector.broadcast %166 : vector<8x1xf32> to vector<8x32xf32>
    %168 = arith.mulf %125, %167 : vector<8x32xf32>
    %169 = vector.broadcast %158 : vector<1x32xf32> to vector<8x32xf32>
    %170 = arith.mulf %168, %169 : vector<8x32xf32>
    %171 = arith.truncf %170 : vector<8x32xf32> to vector<8x32xbf16>
    %c0_56 = arith.constant 0 : index
    %c0_57 = arith.constant 0 : index
    %172 = vector.load %arg10[%c0_56, %c0_57] : memref<32x32xbf16, #tpu.memory_space<vmem>>, vector<32x32xbf16>
    %cst_58 = arith.constant dense<0.000000e+00> : vector<8x32xf32>
    %173 = tpu.matmul %171, %172, %cst_58 {dimension_numbers = #tpu.dot_dimension_numbers<[1], [0], [0], [1], [0, 0, 1, 1], [], []>} : vector<8x32xbf16>, vector<32x32xbf16>, vector<8x32xf32> -> vector<8x32xf32>
    %c0_59 = arith.constant 0 : index
    %c0_60 = arith.constant 0 : index
    %174 = vector.load %arg11[%c0_59, %c0_60] : memref<8x8xf32, #tpu.memory_space<vmem>>, vector<8x8xf32>
    %c0_61 = arith.constant 0 : index
    %c0_62 = arith.constant 0 : index
    %175 = vector.load %arg12[%c0_61, %c0_62] : memref<8x8xf32, #tpu.memory_space<vmem>>, vector<8x8xf32>
    %176 = vector.extract_strided_slice %141 {offsets = [0, 0], sizes = [8, 8], strides = [1, 1]} : vector<8x32xf32> to vector<8x8xf32>
    %177 = vector.extract_strided_slice %141 {offsets = [0, 8], sizes = [8, 8], strides = [1, 1]} : vector<8x32xf32> to vector<8x8xf32>
    %178 = vector.extract_strided_slice %141 {offsets = [0, 16], sizes = [8, 8], strides = [1, 1]} : vector<8x32xf32> to vector<8x8xf32>
    %179 = vector.extract_strided_slice %141 {offsets = [0, 24], sizes = [8, 8], strides = [1, 1]} : vector<8x32xf32> to vector<8x8xf32>
    %180 = vector.shape_cast %176 : vector<8x8xf32> to vector<1x8x8xf32>
    %181 = vector.shape_cast %177 : vector<8x8xf32> to vector<1x8x8xf32>
    %182 = vector.shape_cast %178 : vector<8x8xf32> to vector<1x8x8xf32>
    %183 = vector.shape_cast %179 : vector<8x8xf32> to vector<1x8x8xf32>
    %184 = tpu.concatenate %180, %181, %182, %183 in 0 : vector<1x8x8xf32>, vector<1x8x8xf32>, vector<1x8x8xf32>, vector<1x8x8xf32> -> vector<4x8x8xf32>
    %185 = vector.extract_strided_slice %184 {offsets = [0, 0, 4], sizes = [4, 8, 4], strides = [1, 1, 1]} : vector<4x8x8xf32> to vector<4x8x4xf32>
    %186 = vector.extract_strided_slice %184 {offsets = [0, 0, 0], sizes = [4, 8, 4], strides = [1, 1, 1]} : vector<4x8x8xf32> to vector<4x8x4xf32>
    %187 = tpu.concatenate %185, %186 in 2 : vector<4x8x4xf32>, vector<4x8x4xf32> -> vector<4x8x8xf32>
    %188 = vector.shape_cast %174 : vector<8x8xf32> to vector<1x8x8xf32>
    %189 = vector.broadcast %188 : vector<1x8x8xf32> to vector<4x8x8xf32>
    %190 = arith.mulf %184, %189 : vector<4x8x8xf32>
    %191 = vector.shape_cast %175 : vector<8x8xf32> to vector<1x8x8xf32>
    %192 = vector.broadcast %191 : vector<1x8x8xf32> to vector<4x8x8xf32>
    %193 = arith.mulf %187, %192 : vector<4x8x8xf32>
    %194 = arith.addf %190, %193 : vector<4x8x8xf32>
    %cst_63 = arith.constant 0.353553385 : f32
    %195 = vector.broadcast %cst_63 : f32 to vector<4x8x8xf32>
    %196 = arith.mulf %194, %195 : vector<4x8x8xf32>
    %197 = vector.extract_strided_slice %157 {offsets = [0, 0], sizes = [8, 8], strides = [1, 1]} : vector<8x32xf32> to vector<8x8xf32>
    %198 = vector.extract_strided_slice %157 {offsets = [0, 8], sizes = [8, 8], strides = [1, 1]} : vector<8x32xf32> to vector<8x8xf32>
    %199 = vector.extract_strided_slice %157 {offsets = [0, 16], sizes = [8, 8], strides = [1, 1]} : vector<8x32xf32> to vector<8x8xf32>
    %200 = vector.extract_strided_slice %157 {offsets = [0, 24], sizes = [8, 8], strides = [1, 1]} : vector<8x32xf32> to vector<8x8xf32>
    %201 = vector.shape_cast %197 : vector<8x8xf32> to vector<1x8x8xf32>
    %202 = vector.shape_cast %198 : vector<8x8xf32> to vector<1x8x8xf32>
    %203 = vector.shape_cast %199 : vector<8x8xf32> to vector<1x8x8xf32>
    %204 = vector.shape_cast %200 : vector<8x8xf32> to vector<1x8x8xf32>
    %205 = tpu.concatenate %201, %202, %203, %204 in 0 : vector<1x8x8xf32>, vector<1x8x8xf32>, vector<1x8x8xf32>, vector<1x8x8xf32> -> vector<4x8x8xf32>
    %206 = vector.extract_strided_slice %205 {offsets = [0, 0, 4], sizes = [4, 8, 4], strides = [1, 1, 1]} : vector<4x8x8xf32> to vector<4x8x4xf32>
    %207 = vector.extract_strided_slice %205 {offsets = [0, 0, 0], sizes = [4, 8, 4], strides = [1, 1, 1]} : vector<4x8x8xf32> to vector<4x8x4xf32>
    %208 = tpu.concatenate %206, %207 in 2 : vector<4x8x4xf32>, vector<4x8x4xf32> -> vector<4x8x8xf32>
    %209 = vector.shape_cast %174 : vector<8x8xf32> to vector<1x8x8xf32>
    %210 = vector.broadcast %209 : vector<1x8x8xf32> to vector<4x8x8xf32>
    %211 = arith.mulf %205, %210 : vector<4x8x8xf32>
    %212 = vector.shape_cast %175 : vector<8x8xf32> to vector<1x8x8xf32>
    %213 = vector.broadcast %212 : vector<1x8x8xf32> to vector<4x8x8xf32>
    %214 = arith.mulf %208, %213 : vector<4x8x8xf32>
    %215 = arith.addf %211, %214 : vector<4x8x8xf32>
    %216 = arith.truncf %215 : vector<4x8x8xf32> to vector<4x8x8xbf16>
    %217 = vector.extract_strided_slice %173 {offsets = [0, 0], sizes = [8, 8], strides = [1, 1]} : vector<8x32xf32> to vector<8x8xf32>
    %218 = vector.extract_strided_slice %173 {offsets = [0, 8], sizes = [8, 8], strides = [1, 1]} : vector<8x32xf32> to vector<8x8xf32>
    %219 = vector.extract_strided_slice %173 {offsets = [0, 16], sizes = [8, 8], strides = [1, 1]} : vector<8x32xf32> to vector<8x8xf32>
    %220 = vector.extract_strided_slice %173 {offsets = [0, 24], sizes = [8, 8], strides = [1, 1]} : vector<8x32xf32> to vector<8x8xf32>
    %221 = vector.shape_cast %217 : vector<8x8xf32> to vector<1x8x8xf32>
    %222 = vector.shape_cast %218 : vector<8x8xf32> to vector<1x8x8xf32>
    %223 = vector.shape_cast %219 : vector<8x8xf32> to vector<1x8x8xf32>
    %224 = vector.shape_cast %220 : vector<8x8xf32> to vector<1x8x8xf32>
    %225 = tpu.concatenate %221, %222, %223, %224 in 0 : vector<1x8x8xf32>, vector<1x8x8xf32>, vector<1x8x8xf32>, vector<1x8x8xf32> -> vector<4x8x8xf32>
    %226 = arith.truncf %225 : vector<4x8x8xf32> to vector<4x8x8xbf16>
    %c0_64 = arith.constant 0 : index
    %c0_65 = arith.constant 0 : index
    %227 = vector.load %arg13[%c0_64, %c0_65] : memref<32x32xbf16, #tpu.memory_space<vmem>>, vector<32x32xbf16>
    %c0_66 = arith.constant 0 : index
    %c0_67 = arith.constant 0 : index
    %228 = vector.load %arg14[%c0_66, %c0_67] : memref<1x32xf32, #tpu.memory_space<vmem>>, vector<1x32xf32>
    %c0_68 = arith.constant 0 : index
    %c0_69 = arith.constant 0 : index
    %229 = vector.load %arg15[%c0_68, %c0_69] : memref<32x128xbf16, #tpu.memory_space<vmem>>, vector<32x128xbf16>
    %c0_70 = arith.constant 0 : index
    %c0_71 = arith.constant 0 : index
    %230 = vector.load %arg16[%c0_70, %c0_71] : memref<1x128xf32, #tpu.memory_space<vmem>>, vector<1x128xf32>
    %c0_72 = arith.constant 0 : index
    %c0_73 = arith.constant 0 : index
    %231 = vector.load %arg17[%c0_72, %c0_73] : memref<128x32xbf16, #tpu.memory_space<vmem>>, vector<128x32xbf16>
    %c0_74 = arith.constant 0 : index
    %c0_75 = arith.constant 0 : index
    %232 = vector.load %arg18[%c0_74, %c0_75] : memref<1x32xf32, #tpu.memory_space<vmem>>, vector<1x32xf32>
    %233 = arith.truncf %196 : vector<4x8x8xf32> to vector<4x8x8xbf16>
    "tpu.trace_start"() <{level = 10 : i32, message = "hqd,hkd->hqk"}> : () -> ()
    %cst_76 = arith.constant dense<0.000000e+00> : vector<4x8x8xf32>
    %234 = tpu.matmul %233, %216, %cst_76 {dimension_numbers = #tpu.dot_dimension_numbers<[2], [2], [1], [1], [0, 0, 0, 1, 1, 1], [0], [0]>} : vector<4x8x8xbf16>, vector<4x8x8xbf16>, vector<4x8x8xf32> -> vector<4x8x8xf32>
    "tpu.trace_stop"() : () -> ()
    %235 = tpu.iota {dimensions = array<i32: 0>} : vector<8x8xi32>
    %c0_i32 = arith.constant 0 : i32
    %236 = vector.broadcast %c0_i32 : i32 to vector<8x8xi32>
    %237 = arith.addi %236, %235 : vector<8x8xi32>
    %238 = tpu.iota {dimensions = array<i32: 1>} : vector<8x8xi32>
    %239 = arith.cmpi sge, %237, %238 : vector<8x8xi32>
    %cst_77 = arith.constant -1.000000e+30 : f32
    %240 = vector.shape_cast %239 : vector<8x8xi1> to vector<1x8x8xi1>
    %241 = vector.broadcast %240 : vector<1x8x8xi1> to vector<4x8x8xi1>
    %242 = vector.broadcast %cst_77 : f32 to vector<4x8x8xf32>
    %243 = arith.select %241, %234, %242 : vector<4x8x8xi1>, vector<4x8x8xf32>
    %cst_78 = arith.constant dense<0xFF800000> : vector<4x8xf32>
    %244 = vector.multi_reduction <maximumf>, %243, %cst_78 [2] : vector<4x8x8xf32> to vector<4x8xf32>
    %245 = vector.shape_cast %244 : vector<4x8xf32> to vector<4x8x1xf32>
    %246 = vector.broadcast %245 : vector<4x8x1xf32> to vector<4x8x8xf32>
    %247 = arith.subf %243, %246 : vector<4x8x8xf32>
    %248 = math.exp %247 : vector<4x8x8xf32>
    %cst_79 = arith.constant dense<0.000000e+00> : vector<4x8xf32>
    %249 = vector.multi_reduction <add>, %248, %cst_79 [2] : vector<4x8x8xf32> to vector<4x8xf32>
    %250 = vector.shape_cast %249 : vector<4x8xf32> to vector<4x8x1xf32>
    %251 = tpu.reciprocal %250 {approx = true} : vector<4x8x1xf32> -> vector<4x8x1xf32>
    %252 = vector.broadcast %251 : vector<4x8x1xf32> to vector<4x8x8xf32>
    %253 = arith.mulf %248, %252 : vector<4x8x8xf32>
    %254 = arith.truncf %253 : vector<4x8x8xf32> to vector<4x8x8xbf16>
    "tpu.trace_start"() <{level = 10 : i32, message = "hqk,hkd->hqd"}> : () -> ()
    %cst_80 = arith.constant dense<0.000000e+00> : vector<4x8x8xf32>
    %255 = tpu.matmul %254, %226, %cst_80 {dimension_numbers = #tpu.dot_dimension_numbers<[2], [1], [1], [2], [0, 0, 0, 1, 1, 2], [0], [0]>} : vector<4x8x8xbf16>, vector<4x8x8xbf16>, vector<4x8x8xf32> -> vector<4x8x8xf32>
    "tpu.trace_stop"() : () -> ()
    %256 = vector.extract_strided_slice %255 {offsets = [0, 0, 0], sizes = [1, 8, 8], strides = [1, 1, 1]} : vector<4x8x8xf32> to vector<1x8x8xf32>
    %257 = vector.shape_cast %256 : vector<1x8x8xf32> to vector<8x8xf32>
    %258 = vector.extract_strided_slice %255 {offsets = [1, 0, 0], sizes = [1, 8, 8], strides = [1, 1, 1]} : vector<4x8x8xf32> to vector<1x8x8xf32>
    %259 = vector.shape_cast %258 : vector<1x8x8xf32> to vector<8x8xf32>
    %260 = vector.extract_strided_slice %255 {offsets = [2, 0, 0], sizes = [1, 8, 8], strides = [1, 1, 1]} : vector<4x8x8xf32> to vector<1x8x8xf32>
    %261 = vector.shape_cast %260 : vector<1x8x8xf32> to vector<8x8xf32>
    %262 = vector.extract_strided_slice %255 {offsets = [3, 0, 0], sizes = [1, 8, 8], strides = [1, 1, 1]} : vector<4x8x8xf32> to vector<1x8x8xf32>
    %263 = vector.shape_cast %262 : vector<1x8x8xf32> to vector<8x8xf32>
    %264 = tpu.concatenate %257, %259, %261, %263 in 1 : vector<8x8xf32>, vector<8x8xf32>, vector<8x8xf32>, vector<8x8xf32> -> vector<8x32xf32>
    %265 = arith.truncf %264 : vector<8x32xf32> to vector<8x32xbf16>
    %cst_81 = arith.constant dense<0.000000e+00> : vector<8x32xf32>
    %266 = tpu.matmul %265, %227, %cst_81 {dimension_numbers = #tpu.dot_dimension_numbers<[1], [0], [0], [1], [0, 0, 1, 1], [], []>} : vector<8x32xbf16>, vector<32x32xbf16>, vector<8x32xf32> -> vector<8x32xf32>
    %267 = arith.addf %266, %55 : vector<8x32xf32>
    %268 = arith.mulf %267, %267 : vector<8x32xf32>
    %cst_82 = arith.constant dense<0.000000e+00> : vector<8xf32>
    %269 = vector.multi_reduction <add>, %268, %cst_82 [1] : vector<8x32xf32> to vector<8xf32>
    %270 = vector.shape_cast %269 : vector<8xf32> to vector<8x1xf32>
    %cst_83 = arith.constant 3.200000e+01 : f32
    %271 = vector.broadcast %cst_83 : f32 to vector<8x1xf32>
    %272 = arith.divf %270, %271 : vector<8x1xf32>
    %cst_84 = arith.constant 1.1920929E-7 : f32
    %273 = vector.broadcast %cst_84 : f32 to vector<8x1xf32>
    %274 = arith.addf %272, %273 : vector<8x1xf32>
    %275 = math.rsqrt %274 : vector<8x1xf32>
    %276 = vector.broadcast %275 : vector<8x1xf32> to vector<8x32xf32>
    %277 = arith.mulf %267, %276 : vector<8x32xf32>
    %278 = vector.broadcast %228 : vector<1x32xf32> to vector<8x32xf32>
    %279 = arith.mulf %277, %278 : vector<8x32xf32>
    %280 = arith.truncf %279 : vector<8x32xf32> to vector<8x32xbf16>
    %cst_85 = arith.constant dense<0.000000e+00> : vector<8x128xf32>
    %281 = tpu.matmul %280, %229, %cst_85 {dimension_numbers = #tpu.dot_dimension_numbers<[1], [0], [0], [1], [0, 0, 1, 1], [], []>} : vector<8x32xbf16>, vector<32x128xbf16>, vector<8x128xf32> -> vector<8x128xf32>
    %282 = vector.broadcast %230 : vector<1x128xf32> to vector<8x128xf32>
    %283 = arith.addf %281, %282 : vector<8x128xf32>
    %cst_86 = arith.constant 5.000000e-01 : f32
    %284 = vector.broadcast %cst_86 : f32 to vector<8x128xf32>
    %285 = arith.mulf %284, %283 : vector<8x128xf32>
    %cst_87 = arith.constant 0.707106769 : f32
    %286 = vector.broadcast %cst_87 : f32 to vector<8x128xf32>
    %287 = arith.mulf %283, %286 : vector<8x128xf32>
    %288 = math.erf %287 : vector<8x128xf32>
    %cst_88 = arith.constant 1.000000e+00 : f32
    %289 = vector.broadcast %cst_88 : f32 to vector<8x128xf32>
    %290 = arith.addf %289, %288 : vector<8x128xf32>
    %291 = arith.mulf %285, %290 : vector<8x128xf32>
    %292 = arith.truncf %291 : vector<8x128xf32> to vector<8x128xbf16>
    %cst_89 = arith.constant dense<0.000000e+00> : vector<8x32xf32>
    %293 = tpu.matmul %292, %231, %cst_89 {dimension_numbers = #tpu.dot_dimension_numbers<[1], [0], [0], [1], [0, 0, 1, 1], [], []>} : vector<8x128xbf16>, vector<128x32xbf16>, vector<8x32xf32> -> vector<8x32xf32>
    %294 = vector.broadcast %232 : vector<1x32xf32> to vector<8x32xf32>
    %295 = arith.addf %293, %294 : vector<8x32xf32>
    %296 = arith.addf %295, %266 : vector<8x32xf32>
    %c0_90 = arith.constant 0 : index
    %c0_91 = arith.constant 0 : index
    %c0_92 = arith.constant 0 : index
    %297 = vector.load %arg19[%c0_90, %c0_91, %c0_92] : memref<1x8x32xf32, #tpu.memory_space<vmem>>, vector<1x8x32xf32>
    %298 = vector.shape_cast %297 : vector<1x8x32xf32> to vector<8x32xf32>
    %299 = vector.shape_cast %296 : vector<8x32xf32> to vector<1x8x32xf32>
    tpu.vector_store %arg19[%c0_90, %c0_91, %c0_92], %299 {strides = array<i32>} : memref<1x8x32xf32, #tpu.memory_space<vmem>>, vector<1x8x32xf32>,
    return
  }
  func.func @transform_0(%arg0: i32) -> (i32, i32, i32, i32) {
    %c0_i32 = arith.constant 0 : i32
    %c0_i32_0 = arith.constant 0 : i32
    %c0_i32_1 = arith.constant 0 : i32
    %c0_i32_2 = arith.constant 0 : i32
    return %c0_i32, %arg0, %c0_i32_0, %c0_i32_1 : i32, i32, i32, i32
  }
  func.func @transform_1(%arg0: i32) -> (i32, i32) {
    %c0_i32 = arith.constant 0 : i32
    %c0_i32_0 = arith.constant 0 : i32
    %c0_i32_1 = arith.constant 0 : i32
    return %c0_i32, %c0_i32_0 : i32, i32
  }
  func.func @transform_2(%arg0: i32) -> (i32, i32) {
    %c0_i32 = arith.constant 0 : i32
    %c0_i32_0 = arith.constant 0 : i32
    %c0_i32_1 = arith.constant 0 : i32
    return %c0_i32, %c0_i32_0 : i32, i32
  }
  func.func @transform_3(%arg0: i32) -> (i32, i32) {
    %c0_i32 = arith.constant 0 : i32
    %c0_i32_0 = arith.constant 0 : i32
    %c0_i32_1 = arith.constant 0 : i32
    return %c0_i32, %c0_i32_0 : i32, i32
  }
  func.func @transform_4(%arg0: i32) -> (i32, i32) {
    %c0_i32 = arith.constant 0 : i32
    %c0_i32_0 = arith.constant 0 : i32
    %c0_i32_1 = arith.constant 0 : i32
    return %c0_i32, %c0_i32_0 : i32, i32
  }
  func.func @transform_5(%arg0: i32) -> (i32, i32) {
    %c0_i32 = arith.constant 0 : i32
    %c0_i32_0 = arith.constant 0 : i32
    %c0_i32_1 = arith.constant 0 : i32
    return %c0_i32, %c0_i32_0 : i32, i32
  }
  func.func @transform_6(%arg0: i32) -> (i32, i32) {
    %c0_i32 = arith.constant 0 : i32
    %c0_i32_0 = arith.constant 0 : i32
    %c0_i32_1 = arith.constant 0 : i32
    return %c0_i32, %c0_i32_0 : i32, i32
  }
  func.func @transform_7(%arg0: i32) -> (i32, i32) {
    %c0_i32 = arith.constant 0 : i32
    %c0_i32_0 = arith.constant 0 : i32
    %c0_i32_1 = arith.constant 0 : i32
    return %c0_i32, %c0_i32_0 : i32, i32
  }
  func.func @transform_8(%arg0: i32) -> (i32, i32) {
    %c0_i32 = arith.constant 0 : i32
    %c0_i32_0 = arith.constant 0 : i32
    %c0_i32_1 = arith.constant 0 : i32
    return %c0_i32, %c0_i32_0 : i32, i32
  }
  func.func @transform_9(%arg0: i32) -> (i32, i32) {
    %c0_i32 = arith.constant 0 : i32
    %c0_i32_0 = arith.constant 0 : i32
    %c0_i32_1 = arith.constant 0 : i32
    return %c0_i32, %c0_i32_0 : i32, i32
  }
  func.func @transform_10(%arg0: i32) -> (i32, i32) {
    %c0_i32 = arith.constant 0 : i32
    %c0_i32_0 = arith.constant 0 : i32
    %c0_i32_1 = arith.constant 0 : i32
    return %c0_i32, %c0_i32_0 : i32, i32
  }
  func.func @transform_11(%arg0: i32) -> (i32, i32) {
    %c0_i32 = arith.constant 0 : i32
    %c0_i32_0 = arith.constant 0 : i32
    %c0_i32_1 = arith.constant 0 : i32
    return %c0_i32, %c0_i32_0 : i32, i32
  }
  func.func @transform_12(%arg0: i32) -> (i32, i32) {
    %c0_i32 = arith.constant 0 : i32
    %c0_i32_0 = arith.constant 0 : i32
    %c0_i32_1 = arith.constant 0 : i32
    return %c0_i32, %c0_i32_0 : i32, i32
  }
  func.func @transform_13(%arg0: i32) -> (i32, i32) {
    %c0_i32 = arith.constant 0 : i32
    %c0_i32_0 = arith.constant 0 : i32
    %c0_i32_1 = arith.constant 0 : i32
    return %c0_i32, %c0_i32_0 : i32, i32
  }
  func.func @transform_14(%arg0: i32) -> (i32, i32) {
    %c0_i32 = arith.constant 0 : i32
    %c0_i32_0 = arith.constant 0 : i32
    %c0_i32_1 = arith.constant 0 : i32
    return %c0_i32, %c0_i32_0 : i32, i32
  }
  func.func @transform_15(%arg0: i32) -> (i32, i32) {
    %c0_i32 = arith.constant 0 : i32
    %c0_i32_0 = arith.constant 0 : i32
    %c0_i32_1 = arith.constant 0 : i32
    return %c0_i32, %c0_i32_0 : i32, i32
  }
  func.func @transform_16(%arg0: i32) -> (i32, i32) {
    %c0_i32 = arith.constant 0 : i32
    %c0_i32_0 = arith.constant 0 : i32
    %c0_i32_1 = arith.constant 0 : i32
    return %c0_i32, %c0_i32_0 : i32, i32
  }
  func.func @transform_17(%arg0: i32) -> (i32, i32) {
    %c0_i32 = arith.constant 0 : i32
    %c0_i32_0 = arith.constant 0 : i32
    %c0_i32_1 = arith.constant 0 : i32
    return %c0_i32, %c0_i32_0 : i32, i32
  }
  func.func @transform_18(%arg0: i32) -> (i32, i32, i32) {
    %c0_i32 = arith.constant 0 : i32
    %c0_i32_0 = arith.constant 0 : i32
    %c0_i32_1 = arith.constant 0 : i32
    return %arg0, %c0_i32, %c0_i32_0 : i32, i32, i32
  }
}

</mosaic_0001>

<bundles_post_ra>
// kernel: tpu_custom_call.1
= control target key start
LH: loop header
LB: loop body
LE: loop exit
PB: predicated region body
PF: predicated region fallthrough
CT: control target
= control target key end

     0   :  { %s3519_s0 = inlined_call_operand.vmem [shape: f32[3,2,8,32], index: 0, kind: input, shape index: {}]   ;;  %s3520_s1 = inlined_call_operand.hbm [shape: f32[1,32], index: 1, kind: input, shape index: {}]   ;;  %s3521_s2 = inlined_call_operand.vmem [shape: bf16[32,3], index: 2, kind: input, shape index: {}]   ;;  %s3522_s3 = inlined_call_operand.hbm [shape: f32[3,3], index: 3, kind: input, shape index: {}]   ;;  %s3523_s4 = inlined_call_operand.hbm [shape: f32[1,32], index: 4, kind: input, shape index: {}]   ;;  %s3524_s5 = inlined_call_operand.vmem [shape: bf16[32,32], index: 5, kind: input, shape index: {}]   ;;  %s3525_s6 = inlined_call_operand.hbm [shape: f32[1,32], index: 6, kind: input, shape index: {}]   ;;  %s3526_s7 = inlined_call_operand.vmem [shape: bf16[32,32], index: 7, kind: input, shape index: {}]   ;;  %s3527_s8 = inlined_call_operand.hbm [shape: f32[1,32], index: 8, kind: input, shape index: {}]   ;;  %s3528_s9 = inlined_call_operand.vmem [shape: bf16[32,32], index: 9, kind: input, shape index: {}]   ;;  %s3529_s10 = inlined_call_operand.hbm [shape: f32[8,8], index: 10, kind: input, shape index: {}]   ;;  %s3530_s11 = inlined_call_operand.hbm [shape: f32[8,8], index: 11, kind: input, shape index: {}]   ;;  %s3531_s12 = inlined_call_operand.vmem [shape: bf16[32,32], index: 12, kind: input, shape index: {}]   ;;  %s3532_s13 = inlined_call_operand.vmem [shape: f32[1,32], index: 13, kind: input, shape index: {}]   ;;  %s3533_s14 = inlined_call_operand.vmem [shape: bf16[32,128], index: 14, kind: input, shape index: {}]   ;;  %s3534_s15 = inlined_call_operand.vmem [shape: f32[1,128], index: 15, kind: input, shape index: {}]   ;;  %s3535_s16 = inlined_call_operand.vmem [shape: bf16[128,32], index: 16, kind: input, shape index: {}]   ;;  %s3536_s17 = inlined_call_operand.vmem [shape: f32[1,32], index: 17, kind: input, shape index: {}]   ;;  %s3537_s18 = inlined_call_operand.hbm [shape: f32[2,8,32], index: 18, kind: output, shape index: {}]  }
   0x1   :  { %3551 = sst [smem:[#allocation28_spill]] %s3519_s0 }
   0x2   :  { %3552 = sst [smem:[#allocation29_spill]] %s3520_s1 }
   0x3   :  { %3553 = sst [smem:[#allocation30_spill]] %s3521_s2 }
   0x4   :  { %3554 = sst [smem:[#allocation31_spill]] %s3523_s4 }
   0x5   :  { %3555 = sst [smem:[#allocation32_spill]] %s3532_s13 }
   0x6   :  { %3556 = sst [smem:[#allocation33_spill]] %s3534_s15 }
   0x7   :  { %3557 = sst [smem:[#allocation34_spill]] %s3535_s16 }
   0x8   :  { %3558 = sst [smem:[#allocation35_spill]] %s3536_s17 }
   0x9   :  { %3559 = sst [smem:[#allocation36_spill]] %s3537_s18 }
   0xa   :  { %23 = vsyncpa [#allocation4], 0 }
   0xb   :  { %24 = vsyncpa [#allocation6], 0 }
   0xc   :  { %25 = vsyncpa [#allocation9], 0 }
   0xd   :  { %26 = vsyncpa [#allocation12], 0 }
   0xe   :  { %27 = vsyncpa [#allocation15], 0 }
   0xf   :  { %28 = vsyncpa [#allocation5], 0 }
  0x10   :  { %30 = vsyncpa [#allocation5 + $0x1], 0  ;;  %s2926_s27 = smov 0   ;;  %s2928_s28 = smov 0  }
  0x11   :  { %s2930_s29 = smov 0   ;;  %s2932_s30 = smov 0  }
  0x12 LB: > { %3560 = sst [smem:[#allocation23_spill]] %s2796_s27  ;;  %s2947_s0 = sadd.s32 4294967295, %s2808_s30   ;;  %s2808_s30 = sphi %s2932_s30, %s3597_s30   ;;  %s2804_s29 = sphi %s2930_s29, %s3601_s29   ;;  %s2800_s28 = sphi %s2928_s28, %s3600_s28   ;;  %s2796_s27 = sphi %s2926_s27, %s3599_s27  }
  0x13   : > { %s2129_s19 = sadd.s32 4294967294, %s2808_s30   ;;  %s2951_s1 = sadd.s32 1, %s2808_s30  }
  0x14   : > { %3561 = sst [smem:[#allocation24_spill]] %s2951_s1  ;;  %s43_s20 = sadd.s32 1, %s2804_s29 }
  0x15   : > { %s40_s21 = ssub.s32 %s2808_s30, %s2951_s1  ;;  %p50_p0 = scmp.ne.s32.totalorder %s2804_s29, %s2800_s28 }
  0x16   : > { %p41_p1 = scmp.eq.s32.totalorder %s40_s21, 0  ;;  %p51_p2 = scmp.eq.s32.totalorder %s2808_s30, 0 }
  0x17   : > { %p437_p3 = scmp.eq.s32.totalorder %s2947_s0, 1  ;;  %p442_p4 = scmp.ne.s32.totalorder %s2800_s28, %s2796_s27 }
  0x18   : > { %s2963_s22 = scalar_select %p41_p1, %s2804_s29, %s43_s20  }
  0x19   : > { %p2965_p5 = por %p51_p2, %p50_p0  ;;  %p2969_p6 = por %p437_p3, %p50_p0 }
  0x1a   : > { %3562 = sst [smem:[#allocation25_spill]] %s2963_s22  ;;  %p443_p7 = scmp.eq.s32.totalorder %s2129_s19, 1 }
  0x1b   : > { %s3563_s2 = scalar_select %p2965_p5, 1, 0 }
  0x1c   : > { %s3564_s23 = scalar_select %p2969_p6, 1, 0 }
  0x1d   : > { %p2130_p8 = scmp.ge.s32.totalorder %s2808_s30, 1  ;;  %p450_p9 = scmp.lt.s32.totalorder %s2808_s30, 3 }
  0x1e   : > { %3565 = sst [smem:[#allocation26_spill]] %s3564_s23  ;;  %p2975_p10 = por %p443_p7, %p442_p4 }
  0x1f   : > { %p3547_p11 = scmp.eq.s32.totalorder %s2947_s0, 0  ;;  %p2980_p12 = pnand %p2130_p8, %p450_p9 }
  0x20   : > { %s3566_s24 = scalar_select %p2975_p10, 1, 0 }
  0x21   : > { %s3568_s25 = scalar_select %p2980_p12, 1, 0 }
  0x22   : > { %3567 = sst [smem:[#allocation27_spill]] %s3566_s24  ;;  %s2810_s26 = smov [#allocation8]  }
  0x23   : > { %s486_s20 = sshll.u32 %s2810_s26, 4  ;;  %p2395_p13 = pneg %p2980_p12  ;;  %s487_s20 = int_to_ptr.vmem [resolvable:$true] %s486_s20 }
  0x24   : > { %s2811_s21 = smov [#allocation11]   ;;  %s2812_s1 = smov [#allocation3]  }
  0x25   : > { %s514_s22 = sshll.u32 %s2811_s21, 4  ;;  %p2988_p0 = pnand %p3547_p11, %p2395_p13  ;;  %s2992_s22 = int_to_ptr.vmem [resolvable:$true] %s514_s22 }
  0x26   : > { %s463_s24 = sshll.u32 %s2812_s1, 4  ;;  %s3570_s4 = sld [smem:[#allocation31_spill]]  ;;  %s2994_s24 = int_to_ptr.vmem [resolvable:$true] %s463_s24 }
  0x27   : > { %p3004_p2 = pneg %p2988_p0 }
  0x2c   : > { %s2545_s26 = scalar_lea.hbm %s3570_s4, 16 }
  0x2d   : > { %p2546_p1 = scmp.ne.s32.totalorder %s3570_s4, %s2545_s26  ;;  %p2552_p7 = scmp.lt.u32.totalorder %s2545_s26, %s3570_s4 }
  0x2f   : > { %p2548_p3 = pnand %p3004_p2, %p2546_p1 }
  0x31   : > { %p2549_p4 = pneg %p2548_p3 }
  0x33   : > { %p2554_p8 = pnand %p2552_p7, %p2549_p4 }
  0x35   : > { %2557 = shalt.err (!%p2554_p8)
}
  0x36   : > { %s2558_s18 = scalar_lea.vmem %s487_s20, 16  ;;  %s2565_s17 = scalar_lea.vmem %s487_s20, 32 }
  0x37   : > { %p2559_p9 = scmp.ne.s32.totalorder %s487_s20, %s2558_s18  ;;  %p2566_p10 = scmp.lt.s32.totalorder %s487_s20, %s487_s20 }
  0x38   : > { %p2567_p6 = scmp.lt.s32.totalorder %s2565_s17, %s2558_s18 }
  0x39   : > { %p2561_p13 = pnand %p2559_p9, %p3004_p2 }
  0x3a   : > { %p2568_p12 = por %p2567_p6, %p2566_p10 }
  0x3b   : > { %p2562_p11 = pneg %p2561_p13 }
  0x3d   : > { %p2569_p5 = pnand %p2568_p12, %p2562_p11 }
  0x3f   : > { %2572 = shalt.err (!%p2569_p5)
}
  0x40   : > { %2404 = dma.hbm_to_vmem [thread:$0]  (!%p2988_p0), %s3570_s4, 16, %s487_s20, [#allocation9]  }
  0x41   : > { %s2573_s1 = scalar_lea.hbm %s3527_s8, 16 }
  0x42   : > { %p2574_p1 = scmp.ne.s32.totalorder %s3527_s8, %s2573_s1  ;;  %p2580_p5 = scmp.lt.u32.totalorder %s2573_s1, %s3527_s8 }
  0x44   : > { %p2576_p3 = pnand %p2574_p1, %p3004_p2 }
  0x46   : > { %p2577_p6 = pneg %p2576_p3 }
  0x48   : > { %p2582_p10 = pnand %p2580_p5, %p2577_p6 }
  0x4a   : > { %2585 = shalt.err (!%p2582_p10)
}
  0x4b   : > { %s2586_s20 = scalar_lea.vmem %s2992_s22, 16  ;;  %s2593_s13 = scalar_lea.vmem %s2992_s22, 32 }
  0x4c   : > { %p2587_p11 = scmp.ne.s32.totalorder %s2992_s22, %s2586_s20  ;;  %p2594_p7 = scmp.lt.s32.totalorder %s2992_s22, %s2992_s22 }
  0x4d   : > { %p2595_p8 = scmp.lt.s32.totalorder %s2593_s13, %s2586_s20 }
  0x4e   : > { %p2589_p12 = pnand %p2587_p11, %p3004_p2 }
  0x4f   : > { %p2596_p9 = por %p2595_p8, %p2594_p7 }
  0x50   : > { %p2590_p4 = pneg %p2589_p12 }
  0x52   : > { %p2597_p13 = pnand %p2596_p9, %p2590_p4 }
  0x54   : > { %2600 = shalt.err (!%p2597_p13)
}
  0x55   : > { %2410 = dma.hbm_to_vmem [thread:$0]  (!%p2988_p0), %s3527_s8, 16, %s2992_s22, [#allocation12]  }
  0x56   : > { %s3572_s26 = sld [smem:[#allocation29_spill]] }
  0x5c   : > { %s2601_s1 = scalar_lea.hbm %s3572_s26, 16 }
  0x5d   : > { %p2602_p1 = scmp.ne.s32.totalorder %s3572_s26, %s2601_s1  ;;  %p2608_p5 = scmp.lt.u32.totalorder %s2601_s1, %s3572_s26 }
  0x5f   : > { %p2604_p3 = pnand %p2602_p1, %p3004_p2 }
  0x61   : > { %p2605_p6 = pneg %p2604_p3 }
  0x63   : > { %p2610_p10 = pnand %p2608_p5, %p2605_p6 }
  0x65   : > { %2613 = shalt.err (!%p2610_p10)
}
  0x66   : > { %s2614_s22 = scalar_lea.vmem %s2994_s24, 16  ;;  %s2621_s16 = scalar_lea.vmem %s2994_s24, 32 }
  0x67   : > { %p2615_p11 = scmp.ne.s32.totalorder %s2994_s24, %s2614_s22  ;;  %p2622_p7 = scmp.lt.s32.totalorder %s2994_s24, %s2994_s24 }
  0x68   : > { %p2623_p8 = scmp.lt.s32.totalorder %s2621_s16, %s2614_s22 }
  0x69   : > { %p2617_p12 = pnand %p2615_p11, %p3004_p2 }
  0x6a   : > { %p2624_p9 = por %p2623_p8, %p2622_p7 }
  0x6b   : > { %p2618_p4 = pneg %p2617_p12 }
  0x6d   : > { %p2625_p13 = pnand %p2624_p9, %p2618_p4 }
  0x6f   : > { %2628 = shalt.err (!%p2625_p13)
}
  0x70   : > { %2398 = dma.hbm_to_vmem [thread:$0]  (!%p2988_p0), %s3572_s26, 16, %s2994_s24, [#allocation4]  }
  0x71   : > { %s2629_s18 = scalar_lea.hbm %s3522_s3, 64 }
  0x72   : > { %p2630_p1 = scmp.ne.s32.totalorder %s3522_s3, %s2629_s18  ;;  %p2636_p5 = scmp.lt.u32.totalorder %s2629_s18, %s3522_s3 }
  0x74   : > { %p2632_p3 = pnand %p2630_p1, %p3004_p2 }
  0x76   : > { %p2633_p6 = pneg %p2632_p3 }
  0x78   : > { %p2638_p10 = pnand %p2636_p5, %p2633_p6 }
  0x7a   : > { %2641 = shalt.err (!%p2638_p10)
}
  0x7b   : > { %s2813_s16 = smov [#allocation7]   ;;  %s2814_s23 = smov [#allocation10]  }
  0x7c   : > { %2401 = dma.hbm_to_smem (!%p2988_p0), %s3522_s3, 64, %s2813_s16, [#allocation6]  }
  0x7d   : > { %s500_s15 = sshll.u32 %s2814_s23, 4  ;;  %s2815_s1 = smov [#allocation13]   ;;  %s501_s15 = int_to_ptr.vmem [resolvable:$true] %s500_s15 }
  0x7e   : > { %s528_s17 = sshll.u32 %s2815_s1, 4  ;;  %s2642_s18 = scalar_lea.hbm %s3525_s6, 16  ;;  %s3084_s17 = int_to_ptr.vmem [resolvable:$true] %s528_s17 }
  0x7f   : > { %p2643_p11 = scmp.ne.s32.totalorder %s3525_s6, %s2642_s18  ;;  %p2649_p7 = scmp.lt.u32.totalorder %s2642_s18, %s3525_s6 }
  0x81   : > { %p2645_p12 = pnand %p2643_p11, %p3004_p2 }
  0x83   : > { %p2646_p4 = pneg %p2645_p12 }
  0x85   : > { %p2651_p8 = pnand %p2649_p7, %p2646_p4 }
  0x87   : > { %2654 = shalt.err (!%p2651_p8)
}
  0x88   : > { %s2655_s27 = scalar_lea.vmem %s501_s15, 16  ;;  %s2662_s23 = scalar_lea.vmem %s501_s15, 32 }
  0x89   : > { %p2656_p9 = scmp.ne.s32.totalorder %s501_s15, %s2655_s27  ;;  %p2663_p3 = scmp.lt.s32.totalorder %s501_s15, %s501_s15 }
  0x8a   : > { %p2664_p6 = scmp.lt.s32.totalorder %s2662_s23, %s2655_s27 }
  0x8b   : > { %p2658_p13 = pnand %p2656_p9, %p3004_p2 }
  0x8c   : > { %p2665_p5 = por %p2664_p6, %p2663_p3 }
  0x8d   : > { %p2659_p1 = pneg %p2658_p13 }
  0x8f   : > { %p2666_p10 = pnand %p2665_p5, %p2659_p1 }
  0x91   : > { %2669 = shalt.err (!%p2666_p10)
}
  0x92   : > { %2407 = dma.hbm_to_vmem [thread:$0]  (!%p2988_p0), %s3525_s6, 16, %s501_s15, [#allocation9]  }
  0x93   : > { %s2670_s18 = scalar_lea.hbm %s3529_s10, 128 }
  0x94   : > { %p2671_p11 = scmp.ne.s32.totalorder %s3529_s10, %s2670_s18  ;;  %p2677_p7 = scmp.lt.u32.totalorder %s2670_s18, %s3529_s10 }
  0x96   : > { %p2673_p12 = pnand %p2671_p11, %p3004_p2 }
  0x98   : > { %p2674_p4 = pneg %p2673_p12 }
  0x9a   : > { %p2679_p8 = pnand %p2677_p7, %p2674_p4 }
  0x9c   : > { %2682 = shalt.err (!%p2679_p8)
}
  0x9d   : > { %s2683_s15 = scalar_lea.vmem %s3084_s17, 128  ;;  %p2691_p3 = scmp.lt.s32.totalorder %s3084_s17, %s3084_s17 }
  0x9e   : > { %p2684_p9 = scmp.ne.s32.totalorder %s3084_s17, %s2683_s15  ;;  %p2692_p6 = scmp.lt.s32.totalorder %s2683_s15, %s2683_s15 }
  0xa0   : > { %p2686_p13 = pnand %p2684_p9, %p3004_p2  ;;  %p2693_p5 = por %p2692_p6, %p2691_p3 }
  0xa2   : > { %p2687_p1 = pneg %p2686_p13 }
  0xa4   : > { %p2694_p10 = pnand %p2693_p5, %p2687_p1 }
  0xa6   : > { %2697 = shalt.err (!%p2694_p10)
}
  0xa7   : > { %2413 = dma.hbm_to_vmem [thread:$0]  (!%p2988_p0), %s3529_s10, 128, %s3084_s17, [#allocation12]  }
  0xa8   : > { %s2816_s1 = smov [#allocation14]   ;;  %s2698_s22 = scalar_lea.hbm %s3530_s11, 128 }
  0xa9   : > { %s539_s20 = sshll.u32 %s2816_s1, 4  ;;  %p2699_p11 = scmp.ne.s32.totalorder %s3530_s11, %s2698_s22  ;;  %s540_s20 = int_to_ptr.vmem [resolvable:$true] %s539_s20 }
  0xaa   : > { %p2705_p7 = scmp.lt.u32.totalorder %s2698_s22, %s3530_s11 }
  0xab   : > { %p2701_p12 = pnand %p2699_p11, %p3004_p2 }
  0xad   : > { %p2702_p4 = pneg %p2701_p12 }
  0xaf   : > { %p2707_p8 = pnand %p2705_p7, %p2702_p4 }
  0xb1   : > { %2710 = shalt.err (!%p2707_p8)
}
  0xb2   : > { %s2711_s17 = scalar_lea.vmem %s540_s20, 128  ;;  %p2719_p3 = scmp.lt.s32.totalorder %s540_s20, %s540_s20 }
  0xb3   : > { %p2712_p9 = scmp.ne.s32.totalorder %s540_s20, %s2711_s17  ;;  %p2720_p6 = scmp.lt.s32.totalorder %s2711_s17, %s2711_s17 }
  0xb5   : > { %p2714_p13 = pnand %p2712_p9, %p3004_p2  ;;  %p2721_p5 = por %p2720_p6, %p2719_p3 }
  0xb7   : > { %p2715_p1 = pneg %p2714_p13 }
  0xb9   : > { %p2722_p10 = pnand %p2721_p5, %p2715_p1 }
  0xbb   : > { %2725 = shalt.err (!%p2722_p10)
}
  0xbc   : > { %2416 = dma.hbm_to_vmem [thread:$0]  (!%p2988_p0), %s3530_s11, 128, %s540_s20, [#allocation15]  }
  0xbd   : > { %p2138_p11 = scmp.ge.s32.totalorder %s2808_s30, 2 }
  0xbe   : > { %p3573_p12 = scmp.ne.s32.totalorder (!%p2138_p11), %s3563_s2, 0 }
  0xbf   : > { %564 = sbr.rel (%p2138_p11) target bundleno = 210 (0xd2), region = 84 }
  0xc6   : > { %567 = sbr.rel (!%p3573_p12) target bundleno = 210 (0xd2), region = 88  ;;  %s569_s21 = sand.u32 (%p3573_p12), 1, %s2804_s29  }
  0xc7   : > { %s2139_s1 = sshll.u32 (%p3573_p12), %s2808_s30, 3  ;;  %s2363_s13 = smul.u32 (%p3573_p12), 24, %s569_s21 }
  0xc8   : > { %s3574_s19 = sld [smem:[#allocation28_spill]] (%p3573_p12) }
  0xc9   : > { %s571_s20 = scalar_lea.vmem (%p3573_p12), [#allocation2], %s2363_s13 }
  0xce   : > { %s573_s24 = scalar_lea.vmem %s3574_s19, %s2139_s1 }
  0xcf   : > { %v605_v0 = vld [vmem:[%s573_s24] sm:$0xff]  ;;  %v607_v1 = vld [vmem:[%s573_s24 + $0x10] sm:$0xff] }
  0xd0   : > { %v609_v2 = vld [vmem:[%s573_s24 + $0x20] sm:$0xff]  ;;  %606 = vst [vmem:[%s571_s20] sm:$0xff] %v605_v0  ;;  %608 = vst [vmem:[%s571_s20 + $0x8] sm:$0xff] %v607_v1 }
  0xd1   : > { %610 = vst [vmem:[%s571_s20 + $0x10] sm:$0xff] %v609_v2 }
  0xd2 PF: > { %p3575_p0 = scmp.ne.s32.totalorder %s3568_s25, 0 }
  0xd3   : > { %s3158_s2 = sand.u32 (!%p3575_p0), 1, %s2800_s28   ;;  %p3576_p2 = scmp.eq.s32.totalorder (!%p3575_p0), %s2947_s0, 0 }
  0xd4   : > { %619 = sbr.rel (%p3575_p0) target bundleno = 3120 (0xc30), region = 126 }
  0xd5   : > { %s2364_s16 = smul.u32 (!%p3575_p0), 24, %s3158_s2 }
  0xd7   : > { %s624_s27 = scalar_lea.vmem (!%p3575_p0), [#allocation2], %s2364_s16 }
  0xdb   : > { %2771 = dma.done.wait (%p3576_p2), [#allocation4], 16   ;;  %p3577_p4 = pmov %p3576_p2 }
  0xdc   : > { %p3578_p7 = pmov %p3576_p2 }
  0xdd   : > { %2773 = vsyncadd (%p3577_p4), [#allocation4], 4294967280 }
  0xde   : > { %2775 = dma.done.wait (%p3578_p7), [#allocation6], 64   ;;  %p3579_p8 = pmov %p3576_p2 }
  0xdf   : > { %p3580_p9 = pmov %p3576_p2 }
  0xe0   : > { %2777 = vsyncadd (%p3579_p8), [#allocation6], 4294967232 }
  0xe1   : > { %2779 = dma.done.wait (%p3580_p9), [#allocation9], 32   ;;  %p3581_p13 = pmov %p3576_p2 }
  0xe2   : > { %p3582_p1 = pmov %p3576_p2 }
  0xe3   : > { %2781 = vsyncadd (%p3581_p13), [#allocation9], 4294967264 }
  0xe4   : > { %2783 = dma.done.wait (%p3582_p1), [#allocation12], 144   ;;  %p3583_p3 = pmov %p3582_p1 }
  0xe5   : > { %p3584_p6 = pmov %p3582_p1 }
  0xe6   : > { %2785 = vsyncadd (%p3583_p3), [#allocation12], 4294967152 }
  0xe7   : > { %2787 = dma.done.wait (%p3584_p6), [#allocation15], 128   ;;  %p3585_p5 = pmov %p3582_p1 }
  0xe9   : > { %2789 = vsyncadd (%p3585_p5), [#allocation15], 4294967168 }
  0xea   : > { %656 = sfence }
  0xeb   : > { %v3181_v3 = vld [vmem:[%s624_s27] sm:$0xff]  ;;  %vm712_vm0 = vcmask 261120   ;;  %v3183_v4 = vld [vmem:[%s624_s27 + $0x8] sm:$0xff]  ;;  %v3185_v5 = vld [vmem:[%s624_s27 + $0x10] sm:$0xff]  ;;  %s3586_s17 = sld [smem:[#allocation30_spill]]  ;;  %v2817_v35 = vmov 0  }
  0xec   : > { %v709_v6 = vmul.f32 %v3181_v3, %v3181_v3  ;;  %v710_v7 = vmul.f32 %v3183_v4, %v3183_v4  ;;  %v711_v8 = vmul.f32 %v3185_v5, %v3185_v5  ;;  %v2149_v26 = vld [vmem:[#allocation3] ss:$0 sm:$0xff]  ;;  %2488 = vset.pattern.permute.xlu1 %v2817_v35  ;;  %2489 = vset.pattern.permute.xlu0 %v2817_v35  ;;  %s816_s21 = sld [smem:[#allocation7]]  ;;  %s2155_s1 = sld [smem:[#allocation7 + $0x2]]  ;;  %v2818_v55 = vmov 1  }
  0xed   : > { %s2154_s13 = sld [smem:[#allocation7 + $0x1]]  ;;  %s2156_s18 = sld [smem:[#allocation7 + $0x80]]  ;;  %v2819_v59 = vmov 2   ;;  %vm2821_vm1 = vmmov 0   ;;  %vm1176_vm2 = vcmask 31744   ;;  %vm1296_vm3 = vcmask 64512  }
  0xee   : > { %v713_v9 = vsel %vm712_vm0, %v709_v6, 0.0  ;;  %v716_v10 = vsel %vm712_vm0, %v710_v7, 0.0  ;;  %v719_v11 = vsel %vm712_vm0, %v711_v8, 0.0  ;;  %s2157_s22 = sld [smem:[#allocation7 + $0x81]]  ;;  %s2158_s19 = sld [smem:[#allocation7 + $0x82]]  ;;  %vm1543_vm5 = vcmask 1043456  }
  0xef   : > { %714 = vadd.xlane.f32.xlu0 %v713_v9  ;;  %720 = vadd.xlane.f32.xlu1 %v719_v11  ;;  %s2159_s24 = sld [smem:[#allocation7 + $0x100]]  ;;  %s2161_s20 = sld [smem:[#allocation7 + $0x102]]  ;;  %vm1738_vm6 = vcmask 130048   ;;  %vm1740_vm7 = vcmask 195584  }
  0xf0   : > { %s2160_s16 = sld [smem:[#allocation7 + $0x101]]  ;;  %s2827_s23 = smov 8  }
  0xf1   : > { %v2493_v12 = vld [vmem:[%s3586_s17] sm:$0xff]   ;;  %v2494_v13 = vld [vmem:[%s3586_s17 + $0x8] sm:$0xff]   ;;  %s3587_s15 = sld [smem:[#allocation34_spill]]  ;;  %s3591_s27 = sld [smem:[#allocation26_spill]] }
  0xf2   : > { %2247 = vmatprep.subr.bf16.mxu1 %v2493_v12  ;;  %v817_v36 = vstv %s816_s21  ;;  %v838_v38 = vstv %s2155_s1  ;;  %s2200_s25 = sshll.u32 %s2947_s0, 7  ;;  %s1979_s0 = scalar_lea.sflag [#allocation5], %s3158_s2 }
  0xf3   : > { %717 = vadd.xlane.f32.xlu0 %v716_v10  ;;  %2248 = vmatpush3.bf16.msra.mxu1 %v2493_v12  ;;  %v827_v40 = vstv %s2154_s13  ;;  %v849_v47 = vstv %s2156_s18  ;;  %s2822_s18 = smov 124   ;;  %s3592_s13 = sld [smem:[#allocation36_spill]] }
  0xf4   : > { %2249 = vmatprep.subr.bf16.mxu1 %v2494_v13  ;;  %v859_v51 = vstv %s2157_s22  ;;  %v870_v54 = vstv %s2158_s19  ;;  %s2823_s22 = smov 120   ;;  %s2824_s19 = smov 4  }
  0xf7   : > { %2250 = vmatpush3.bf16.msra.mxu1 %v2494_v13  ;;  %p3593_p12 = scmp.ne.s32.totalorder %s3591_s27, 0 }
 0x17c   : > { %v715_v14 = vpop.xlane.xlu0 %714  ;;  %v721_v15 = vpop.xlane.xlu1 %720 }
 0x17d   : > { %v723_v16 = vmul.f32 0.03125, %v715_v14  ;;  %v725_v17 = vmul.f32 0.03125, %v721_v15 }
 0x17f   : > { %v726_v18 = vadd.f32 1.1920929e-07, %v723_v16  ;;  %v728_v19 = vadd.f32 1.1920929e-07, %v725_v17  ;;  %v881_v16 = vstv %s2159_s24  ;;  %s2825_s24 = smov 112  }
 0x180   : > { %v718_v20 = vpop.xlane.xlu0 %717 }
 0x181   : > { %2513 = vrsqrt.f32 %v726_v18  ;;  %v724_v21 = vmul.f32 0.03125, %v718_v20  ;;  %v902_v20 = vstv %s2161_s20  ;;  %s2826_s20 = smov 104  }
 0x182   : > { %2515 = vrsqrt.f32 %v728_v19 }
 0x183   : > { %v727_v22 = vadd.f32 1.1920929e-07, %v724_v21 }
 0x185   : > { %2517 = vrsqrt.f32 %v727_v22 }
 0x18b   : > { %v2514_v23 = vpop.eup %2513 }
 0x18c   : > { %v2516_v24 = vpop.eup %2515  ;;  %v732_v27 = vmul.f32 %v2514_v23, %v3181_v3 }
 0x18d   : > { %v734_v25 = vmul.f32 %v2516_v24, %v3185_v5 }
 0x18e   : > { %v741_v31 = vmul.f32 %v2149_v26, %v732_v27  ;;  %v2820_v27 = vmov 0.0  }
 0x18f   : > { %v2518_v28 = vpop.eup %2517  ;;  %v743_v29 = vmul.f32 %v2149_v26, %v734_v25  ;;  %v891_v25 = vstv %s2160_s16  ;;  %2255 = vmatprep.subr.bf16.mxu1 %v2820_v27  ;;  %2279 = vmatprep.subr.bf16.mxu0 %v2820_v27  ;;  %s3590_s16 = sld [smem:[#allocation35_spill]] }
 0x190   : > { %v733_v30 = vmul.f32 %v2518_v28, %v3183_v4  ;;  %2281 = vmatprep.mubr.msk.bf16.mxu0 %vm2821_vm1, %v2820_v27 }
 0x191   : > { %v745_v33 = vpack.c.bf16 %v743_v29, %v743_v29  ;;  %v2496_v29 = vld [vmem:[%s3524_s5 + $0x8] sm:$0xff]  }
 0x192   : > { %v742_v32 = vmul.f32 %v2149_v26, %v733_v30  ;;  %v2495_v26 = vld [vmem:[%s3524_s5] sm:$0xff]  }
 0x194   : > { %v744_v34 = vpack.c.bf16 %v742_v32, %v741_v31 }
 0x196   : > { %2251 = vmatprep.mubr.msk.bf16.mxu1 %vm712_vm0, %v744_v34 }
 0x197   : > { %2252 = vmatmul.mubr.msk.bf16.vlgmr.msra.gmra.mrb[0].mxu1 %vm712_vm0, %v745_v33 }
 0x198   : > { %2256 = vmatpush3.bf16.msra.mxu1 %v2495_v26  ;;  %2259 = vmatprep.mubr.msk.bf16.mxu1 %vm2821_vm1, %v2820_v27 }
 0x199   : > { %2257 = vmatprep.subr.bf16.mxu1 %v2820_v27 }
 0x19c   : > { %2258 = vmatpush3.bf16.msra.mxu1 %v2496_v29 }
 0x19d   : > { %2263 = vmatprep.subr.bf16.mxu1 %v2820_v27 }
 0x26a   : > { %v2253_v37 = vpop.f32.mrb[0].mxu1 }
 0x26b   : > { %v802_v39 = vpop.f32.mrb[1].mxu1  ;;  %v839_v44 = vadd.f32 %v2253_v37, %v838_v38  ;;  %v871_v56 = vadd.f32 %v2253_v37, %v870_v54  ;;  %v903_v22 = vadd.f32 %v2253_v37, %v902_v20  ;;  %v2162_v37 = vld [vmem:[#allocation8] ss:$0 sm:$0xff] }
 0x26c   : > { %v818_v41 = vadd.f32 %v817_v36, %v802_v39  ;;  %v2254_v42 = vpop.f32.mrb[2].mxu1  ;;  %v850_v50 = vadd.f32 %v849_v47, %v802_v39  ;;  %v882_v19 = vadd.f32 %v881_v16, %v802_v39  ;;  %v3292_v16 = vld [vmem:[#allocation13] sm:$0xff] }
 0x26d   : > { %v3207_v43 = vpop.f32.mrb[3].mxu1  ;;  %v840_v49 = vmax.f32 %v839_v44, 0.0  ;;  %v872_v58 = vmax.f32 %v871_v56, 0.0  ;;  %v904_v24 = vmax.f32 %v903_v22, 0.0 }
 0x26e   : > { %v828_v45 = vadd.f32 %v827_v40, %v3207_v43  ;;  %v819_v46 = vmax.f32 %v818_v41, 0.0  ;;  %v860_v52 = vadd.f32 %v859_v51, %v3207_v43  ;;  %v851_v53 = vmax.f32 %v850_v50, 0.0  ;;  %v2497_v41 = vld [vmem:[%s3526_s7] sm:$0xff]  }
 0x26f   : > { %v883_v23 = vmax.f32 %v882_v19, 0.0  ;;  %v892_v28 = vadd.f32 %v891_v25, %v3207_v43  ;;  %v2498_v43 = vld [vmem:[%s3526_s7 + $0x8] sm:$0xff]  }
 0x270   : > { %822 = vperm.xlu1 %2488, %v819_v46   ;;  %v829_v48 = vmax.f32 %v828_v45, 0.0  ;;  %v861_v57 = vmax.f32 %v860_v52, 0.0  ;;  %v2166_v45 = vld [vmem:[#allocation10] ss:$0 sm:$0xff] }
 0x271   : > { %v893_v30 = vmax.f32 %v892_v28, 0.0 }
 0x272   : > { %832 = vperm.xlu0 %2489, %v829_v48  }
 0x274   : > { %843 = vperm.xlu1 %2488, %v840_v49  }
 0x276   : > { %2492 = vset.pattern.permute.xlu0 %v2819_v59 }
 0x278   : > { %2490 = vset.pattern.permute.xlu1 %v2818_v55 }
 0x279   : > { %854 = vperm.xlu1 %2490, %v851_v53  }
 0x27d   : > { %864 = vperm.xlu1 %2490, %v861_v57  }
 0x281   : > { %875 = vperm.xlu1 %2490, %v872_v58  }
 0x285   : > { %2491 = vset.pattern.permute.xlu1 %v2819_v59 }
 0x2ef   : > { %v823_v60 = vpop.permute.xlu1 %822 }
 0x2f0   : > { %v825_v62 = vmul.f32 %v823_v60, %v3181_v3 }
 0x2f1   : > { %v833_v61 = vpop.permute.xlu0 %832 }
 0x2f2   : > { %v835_v63 = vmul.f32 %v833_v61, %v3183_v4 }
 0x2f3   : > { %v844_v0 = vpop.permute.xlu1 %843 }
 0x2f4   : > { %v836_v1 = vadd.f32 %v835_v63, %v825_v62  ;;  %v846_v2 = vmul.f32 %v844_v0, %v3185_v5 }
 0x2f6   : > { %v3214_v6 = vadd.f32 %v846_v2, %v836_v1 }
 0x2f8   : > { %v855_v7 = vpop.permute.xlu1 %854  ;;  %v913_v8 = vmul.f32 %v3214_v6, %v3214_v6 }
 0x2f9   : > { %v857_v12 = vmul.f32 %v855_v7, %v3181_v3  ;;  %v2499_v7 = vld [vmem:[%s3528_s9] sm:$0xff]  }
 0x2fa   : > { %v914_v9 = vsel %vm712_vm0, %v913_v8, 0.0 }
 0x2fb   : > { %915 = vadd.xlane.f32.xlu1 %v914_v9 }
 0x2fc   : > { %v865_v10 = vpop.permute.xlu1 %864 }
 0x2fd   : > { %v867_v11 = vmul.f32 %v865_v10, %v3183_v4 }
 0x2ff   : > { %v868_v14 = vadd.f32 %v867_v11, %v857_v12  ;;  %v3289_v12 = vld [vmem:[#allocation14] sm:$0xff] }
 0x300   : > { %v876_v13 = vpop.permute.xlu1 %875 }
 0x301   : > { %v878_v15 = vmul.f32 %v876_v13, %v3185_v5 }
 0x303   : > { %v879_v17 = vadd.f32 %v878_v15, %v868_v14 }
 0x305   : > { %v989_v18 = vmul.f32 %v879_v17, %v879_v17 }
 0x307   : > { %v990_v21 = vsel %vm712_vm0, %v989_v18, 0.0 }
 0x308   : > { %991 = vadd.xlane.f32.xlu0 %v990_v21 }
 0x30c   : > { %886 = vperm.xlu1 %2491, %v883_v23  }
 0x310   : > { %907 = vperm.xlu1 %2491, %v904_v24  }
 0x31e   : > { %896 = vperm.xlu0 %2492, %v893_v30  }
 0x388   : > { %v916_v31 = vpop.xlane.xlu1 %915 }
 0x389   : > { %v917_v32 = vmul.f32 0.03125, %v916_v31 }
 0x38b   : > { %v918_v33 = vadd.f32 1.1920929e-07, %v917_v32 }
 0x38c   : > { %v887_v57 = vpop.permute.xlu1 %886 }
 0x38d   : > { %2519 = vrsqrt.f32 %v918_v33  ;;  %v889_v60 = vmul.f32 %v887_v57, %v3181_v3 }
 0x390   : > { %v908_v61 = vpop.permute.xlu1 %907 }
 0x391   : > { %v910_v63 = vmul.f32 %v908_v61, %v3185_v5 }
 0x395   : > { %v992_v34 = vpop.xlane.xlu0 %991 }
 0x396   : > { %v993_v35 = vmul.f32 0.03125, %v992_v34 }
 0x397   : > { %v2520_v36 = vpop.eup %2519 }
 0x398   : > { %v920_v38 = vmul.f32 %v2520_v36, %v3214_v6  ;;  %v994_v39 = vadd.f32 1.1920929e-07, %v993_v35  ;;  %v2170_v35 = vld [vmem:[#allocation11] ss:$0 sm:$0xff] }
 0x39a   : > { %2521 = vrsqrt.f32 %v994_v39  ;;  %v927_v40 = vmul.f32 %v2162_v37, %v920_v38 }
 0x39c   : > { %v928_v42 = vpack.c.bf16 %v927_v40, %v927_v40 }
 0x39d   : > { %v897_v58 = vpop.permute.xlu0 %896 }
 0x39e   : > { %2260 = vmatmul.mubr.msk.bf16.vlgmr.msra.gmra.mrb[4].mxu1 %vm712_vm0, %v928_v42  ;;  %v899_v59 = vmul.f32 %v897_v58, %v3183_v4  ;;  %v2500_v4 = vld [vmem:[%s3528_s9 + $0x8] sm:$0xff]  }
 0x39f   : > { %2264 = vmatpush3.bf16.msra.mxu1 %v2497_v41  ;;  %2267 = vmatprep.mubr.msk.bf16.mxu1 %vm2821_vm1, %v2820_v27 }
 0x3a0   : > { %2265 = vmatprep.subr.bf16.mxu1 %v2820_v27  ;;  %v900_v62 = vadd.f32 %v899_v59, %v889_v60 }
 0x3a2   : > { %v911_v0 = vadd.f32 %v910_v63, %v900_v62 }
 0x3a3   : > { %2266 = vmatpush3.bf16.msra.mxu1 %v2498_v43 }
 0x3a4   : > { %v2522_v44 = vpop.eup %2521  ;;  %2271 = vmatprep.subr.bf16.mxu1 %v2820_v27  ;;  %v1065_v1 = vmul.f32 %v911_v0, %v911_v0 }
 0x3a5   : > { %v996_v46 = vmul.f32 %v2522_v44, %v879_v17 }
 0x3a6   : > { %v1066_v2 = vsel %vm712_vm0, %v1065_v1, 0.0 }
 0x3a7   : > { %v1003_v47 = vmul.f32 %v2166_v45, %v996_v46 }
 0x3a9   : > { %v1004_v48 = vpack.c.bf16 %v1003_v47, %v1003_v47 }
 0x3ab   : > { %2268 = vmatmul.mubr.msk.bf16.vlgmr.msra.gmra.mrb[8].mxu1 %vm712_vm0, %v1004_v48 }
 0x3ac   : > { %2275 = vmatprep.mubr.msk.bf16.mxu1 %vm2821_vm1, %v2820_v27  ;;  %2272 = vmatpush3.bf16.msra.mxu1 %v2499_v7 }
 0x3ad   : > { %2273 = vmatprep.subr.bf16.mxu1 %v2820_v27 }
 0x3b0   : > { %2274 = vmatpush3.bf16.msra.mxu1 %v2500_v4 }
 0x3b1   : > { %2285 = vmatprep.subr.bf16.mxu1 %v2820_v27 }
 0x471   : > { %v3253_v49 = vpop.f32.mrb[4].mxu1 }
 0x472   : > { %1152 = vrot.lane.b32.xlu0 %v3253_v49, %s2822_s18  ;;  %1143 = vrot.lane.b32.xlu1 %v3253_v49, %s2823_s22  ;;  %v2261_v50 = vpop.f32.mrb[5].mxu1  ;;  %v1181_v23 = vmul.f32 %v3292_v16, %v3253_v49 }
 0x473   : > { %v985_v51 = vpop.f32.mrb[6].mxu1 }
 0x474   : > { %v2262_v52 = vpop.f32.mrb[7].mxu1 }
 0x476   : > { %1164 = vrot.lane.b32.xlu0 %v3253_v49, %s2824_s19  ;;  %1146 = vrot.lane.b32.xlu1 %v3253_v49, %s2825_s24 }
 0x47e   : > { %v1058_v53 = vpop.f32.mrb[8].mxu1 }
 0x47f   : > { %1207 = vrot.lane.b32.xlu0 %v1058_v53, %s2822_s18  ;;  %1198 = vrot.lane.b32.xlu1 %v1058_v53, %s2823_s22  ;;  %v2269_v54 = vpop.f32.mrb[9].mxu1  ;;  %v1235_v19 = vmul.f32 %v3292_v16, %v1058_v53 }
 0x480   : > { %v1061_v55 = vpop.f32.mrb[10].mxu1 }
 0x481   : > { %v2270_v56 = vpop.f32.mrb[11].mxu1 }
 0x483   : > { %1219 = vrot.lane.b32.xlu0 %v1058_v53, %s2824_s19  ;;  %1201 = vrot.lane.b32.xlu1 %v1058_v53, %s2825_s24 }
 0x487   : > { %1204 = vrot.lane.b32.xlu1 %v1058_v53, %s2826_s20 }
 0x48b   : > { %1149 = vrot.lane.b32.xlu1 %v3253_v49, %s2826_s20 }
 0x4af   : > { %1067 = vadd.xlane.f32.xlu1 %v1066_v2 }
 0x4e4   : > { %v1144_v3 = vpop.permute.xlu1 %1143  ;;  %v1153_v5 = vpop.permute.xlu0 %1152 }
 0x4e5   : > { %1154 = vrot.lane.b32.xlu0 %v1144_v3, %s2822_s18  ;;  %1166 = vrot.lane.b32.xlu1 %v1144_v3, %s2824_s19  ;;  %v1182_v48 = vmul.f32 %v1144_v3, %v3292_v16 }
 0x4e8   : > { %v3284_v8 = vpop.permute.xlu1 %1146  ;;  %v1165_v9 = vpop.permute.xlu0 %1164 }
 0x4e9   : > { %1168 = vrot.lane.b32.xlu1 %v3284_v8, %s2824_s19  ;;  %v1177_v13 = vsel %vm1176_vm2, %v1153_v5, %v1165_v9 }
 0x4ea   : > { %v1185_v20 = vmul.f32 %v1177_v13, %v3289_v12 }
 0x4ec   : > { %v1189_v25 = vadd.f32 %v1185_v20, %v1181_v23 }
 0x4ee   : > { %v1193_v29 = vmul.f32 0.35355338, %v1189_v25 }
 0x4f0   : > { %v1292_v30 = vpack.c.bf16 %v1193_v29, %v1193_v29 }
 0x4f1   : > { %v1199_v10 = vpop.permute.xlu1 %1198  ;;  %v1208_v11 = vpop.permute.xlu0 %1207 }
 0x4f2   : > { %1209 = vrot.lane.b32.xlu0 %v1199_v10, %s2822_s18  ;;  %v1236_v45 = vmul.f32 %v1199_v10, %v3292_v16 }
 0x4f5   : > { %v1202_v14 = vpop.permute.xlu1 %1201  ;;  %v1220_v15 = vpop.permute.xlu0 %1219 }
 0x4f6   : > { %v1231_v17 = vsel %vm1176_vm2, %v1208_v11, %v1220_v15  ;;  %1221 = vrot.lane.b32.xlu0 %v1199_v10, %s2824_s19  ;;  %v1237_v56 = vmul.f32 %v1202_v14, %v3292_v16  ;;  %v1183_v10 = vmul.f32 %v3284_v8, %v3292_v16 }
 0x4f7   : > { %v1239_v18 = vmul.f32 %v1231_v17, %v3289_v12 }
 0x4f9   : > { %v3299_v21 = vpop.permute.xlu1 %1204  ;;  %v1243_v22 = vadd.f32 %v1239_v18, %v1235_v19 }
 0x4fa   : > { %1211 = vrot.lane.b32.xlu0 %v1202_v14, %s2822_s18  ;;  %v1238_v2 = vmul.f32 %v3299_v21, %v3292_v16 }
 0x4fb   : > { %v1247_v24 = vpack.c.bf16 %v1243_v22, %v1243_v22 }
 0x4fd   : > { %v3304_v26 = vpop.permute.xlu1 %1149  ;;  %v1301_v28 = vsel %vm1296_vm3, %v1247_v24, 0 }
 0x4fe   : > { %1223 = vrot.lane.b32.xlu0 %v1202_v14, %s2824_s19  ;;  %1170 = vrot.lane.b32.xlu1 %v3304_v26, %s2824_s19  ;;  %v1184_v20 = vmul.f32 %v3304_v26, %v3292_v16  ;;  %v1481_v16 = vlaneseq }
 0x4ff   : > { %2280 = vmatpush3.bf16.xpose.msra.mxu0 %v1301_v28 }
 0x500   : > { %2291 = vmatprep.subr.bf16.mxu0 %v2820_v27  ;;  %v1484_v28 = vand.u32 127, %v1481_v16 }
 0x502   : > { %1213 = vrot.lane.b32.xlu0 %v3299_v21, %s2822_s18 }
 0x506   : > { %2282 = vmatmul.mubr.msk.bf16.vlgmr.msra.gmra.mrb[0].mxu0 %vm1296_vm3, %v1292_v30  ;;  %1225 = vrot.lane.b32.xlu0 %v3299_v21, %s2824_s19  ;;  %s2148_s19 = sshll.u32 %s3158_s2, 3 }
 0x507   : > { %2293 = vmatprep.mubr.msk.bf16.mxu0 %vm2821_vm1, %v2820_v27 }
 0x50a   : > { %1156 = vrot.lane.b32.xlu0 %v3284_v8, %s2822_s18 }
 0x50e   : > { %1158 = vrot.lane.b32.xlu0 %v3304_v26, %s2822_s18  ;;  %v1482_v26 = vshrl.u32 %v1481_v16, 7  ;;  %s2828_s18 = smov 16  }
 0x510   : > { %vm1485_vm4 = vcmp.ge.s32.totalorder %v1482_v26, %v1484_v28 }
 0x53c   : > { %v1068_v31 = vpop.xlane.xlu1 %1067 }
 0x53d   : > { %v1069_v32 = vmul.f32 0.03125, %v1068_v31 }
 0x53f   : > { %v1070_v33 = vadd.f32 1.1920929e-07, %v1069_v32 }
 0x541   : > { %2523 = vrsqrt.f32 %v1070_v33 }
 0x54b   : > { %v2524_v34 = vpop.eup %2523 }
 0x54c   : > { %v1072_v36 = vmul.f32 %v2524_v34, %v911_v0 }
 0x54e   : > { %v1079_v37 = vmul.f32 %v2170_v35, %v1072_v36 }
 0x550   : > { %v1080_v38 = vpack.c.bf16 %v1079_v37, %v1079_v37 }
 0x552   : > { %2276 = vmatmul.mubr.msk.bf16.vlgmr.msra.gmra.mrb[12].mxu1 %vm712_vm0, %v1080_v38 }
 0x553   : > { %2287 = vmatprep.mubr.msk.bf16.mxu1 %vm2821_vm1, %v2820_v27 }
 0x557   : > { %v1155_v39 = vpop.permute.xlu0 %1154  ;;  %v1167_v40 = vpop.permute.xlu1 %1166 }
 0x558   : > { %v1178_v42 = vsel %vm1176_vm2, %v1155_v39, %v1167_v40 }
 0x559   : > { %v1186_v46 = vmul.f32 %v1178_v42, %v3289_v12 }
 0x55b   : > { %v1190_v51 = vadd.f32 %v1186_v46, %v1182_v48  ;;  %v1169_v4 = vpop.permute.xlu1 %1168 }
 0x55d   : > { %v1194_v57 = vmul.f32 0.35355338, %v1190_v51 }
 0x55f   : > { %v1293_v61 = vpack.c.bf16 %v1194_v57, %v1194_v57 }
 0x564   : > { %v1210_v41 = vpop.permute.xlu0 %1209 }
 0x568   : > { %v1222_v43 = vpop.permute.xlu0 %1221 }
 0x569   : > { %v1232_v44 = vsel %vm1176_vm2, %v1210_v41, %v1222_v43 }
 0x56a   : > { %v1240_v47 = vmul.f32 %v1232_v44, %v3289_v12 }
 0x56c   : > { %v1244_v49 = vadd.f32 %v1240_v47, %v1236_v45  ;;  %v1212_v50 = vpop.permute.xlu0 %1211 }
 0x56e   : > { %v1248_v52 = vpack.c.bf16 %v1244_v49, %v1244_v49 }
 0x570   : > { %v1224_v53 = vpop.permute.xlu0 %1223  ;;  %v1347_v54 = vsel %vm1296_vm3, %v1248_v52, 0  ;;  %v1171_v14 = vpop.permute.xlu1 %1170 }
 0x571   : > { %v1233_v55 = vsel %vm1176_vm2, %v1212_v50, %v1224_v53  ;;  %2286 = vmatpush3.bf16.xpose.msra.mxu1 %v1347_v54 }
 0x572   : > { %v1241_v58 = vmul.f32 %v1233_v55, %v3289_v12  ;;  %2297 = vmatprep.subr.bf16.mxu1 %v2820_v27 }
 0x574   : > { %v1245_v59 = vadd.f32 %v1241_v58, %v1237_v56  ;;  %v1214_v60 = vpop.permute.xlu0 %1213 }
 0x576   : > { %v1249_v62 = vpack.c.bf16 %v1245_v59, %v1245_v59 }
 0x578   : > { %2288 = vmatmul.mubr.msk.bf16.vlgmr.msra.gmra.mrb[16].mxu1 %vm1296_vm3, %v1293_v61  ;;  %v1226_v63 = vpop.permute.xlu0 %1225  ;;  %v1393_v0 = vsel %vm1296_vm3, %v1249_v62, 0 }
 0x579   : > { %v1234_v1 = vsel %vm1176_vm2, %v1214_v60, %v1226_v63  ;;  %2292 = vmatpush3.bf16.xpose.msra.mxu0 %v1393_v0  ;;  %2299 = vmatprep.mubr.msk.bf16.mxu1 %vm2821_vm1, %v2820_v27 }
 0x57a   : > { %v1242_v7 = vmul.f32 %v1234_v1, %v3289_v12  ;;  %2303 = vmatprep.subr.bf16.mxu0 %v2820_v27 }
 0x57c   : > { %v1246_v3 = vadd.f32 %v1242_v7, %v1238_v2  ;;  %v1157_v5 = vpop.permute.xlu0 %1156 }
 0x57d   : > { %v1179_v9 = vsel %vm1176_vm2, %v1157_v5, %v1169_v4 }
 0x57e   : > { %v1250_v11 = vpack.c.bf16 %v1246_v3, %v1246_v3  ;;  %v1187_v13 = vmul.f32 %v1179_v9, %v3289_v12 }
 0x580   : > { %v1191_v15 = vadd.f32 %v1187_v13, %v1183_v10  ;;  %v1159_v17 = vpop.permute.xlu0 %1158  ;;  %v1439_v18 = vsel %vm1296_vm3, %v1250_v11, 0 }
 0x581   : > { %v1180_v19 = vsel %vm1176_vm2, %v1159_v17, %v1171_v14  ;;  %2298 = vmatpush3.bf16.xpose.msra.mxu1 %v1439_v18 }
 0x582   : > { %v1195_v21 = vmul.f32 0.35355338, %v1191_v15  ;;  %v1188_v22 = vmul.f32 %v1180_v19, %v3289_v12  ;;  %2309 = vmatprep.subr.bf16.mxu1 %v2820_v27 }
 0x584   : > { %v1294_v8 = vpack.c.bf16 %v1195_v21, %v1195_v21  ;;  %v1192_v23 = vadd.f32 %v1188_v22, %v1184_v20 }
 0x586   : > { %v1196_v24 = vmul.f32 0.35355338, %v1192_v23  ;;  %2294 = vmatmul.mubr.msk.bf16.vlgmr.msra.gmra.mrb[4].mxu0 %vm1296_vm3, %v1294_v8 }
 0x587   : > { %2305 = vmatprep.mubr.msk.bf16.mxu0 %vm2821_vm1, %v2820_v27 }
 0x588   : > { %v1295_v25 = vpack.c.bf16 %v1196_v24, %v1196_v24 }
 0x58a   : > { %2300 = vmatmul.mubr.msk.bf16.vlgmr.msra.gmra.mrb[20].mxu1 %vm1296_vm3, %v1295_v25 }
 0x58b   : > { %2311 = vmatprep.mubr.msk.bf16.mxu1 %vm2821_vm1, %v2820_v27 }
 0x5d9   : > { %v1337_v12 = vpop.f32.mrb[0].mxu0 }
 0x5da   : > { %v1488_v29 = vsel %vm1485_vm4, %v1337_v12, -1e+30  ;;  %v2283_v30 = vpop.f32.mrb[1].mxu0 }
 0x5db   : > { %v1340_v31 = vpop.f32.mrb[2].mxu0  ;;  %v1492_v32 = vsel %vm1296_vm3, %v1488_v29, -inf }
 0x5dc   : > { %1493 = vmax.xlane.f32.xlu0 %v1492_v32  ;;  %v2284_v33 = vpop.f32.mrb[3].mxu0 }
 0x625   : > { %v3363_v34 = vpop.f32.mrb[12].mxu1 }
 0x626   : > { %v2277_v35 = vpop.f32.mrb[13].mxu1  ;;  %v1261_v36 = vpack.c.bf16 %v3363_v34, %v3363_v34 }
 0x627   : > { %v1137_v37 = vpop.f32.mrb[14].mxu1 }
 0x628   : > { %v2278_v38 = vpop.f32.mrb[15].mxu1  ;;  %v1545_v39 = vsel %vm1543_vm5, %v1261_v36, 0 }
 0x629   : > { %2304 = vmatpush3.bf16.msra.mxu0 %v1545_v39 }
 0x62a   : > { %2315 = vmatprep.subr.bf16.mxu0 %v2820_v27 }
 0x64b   : > { %v1383_v40 = vpop.f32.mrb[16].mxu1 }
 0x64c   : > { %v1489_v41 = vsel %vm1485_vm4, %v1383_v40, -1e+30  ;;  %v2289_v42 = vpop.f32.mrb[17].mxu1 }
 0x64d   : > { %v1386_v43 = vpop.f32.mrb[18].mxu1  ;;  %v1495_v44 = vsel %vm1296_vm3, %v1489_v41, -inf }
 0x64e   : > { %1496 = vmax.xlane.f32.xlu1 %v1495_v44  ;;  %v2290_v45 = vpop.f32.mrb[19].mxu1 }
 0x659   : > { %v1429_v46 = vpop.f32.mrb[4].mxu0 }
 0x65a   : > { %v1490_v47 = vsel %vm1485_vm4, %v1429_v46, -1e+30  ;;  %v2295_v48 = vpop.f32.mrb[5].mxu0 }
 0x65b   : > { %v1432_v49 = vpop.f32.mrb[6].mxu0  ;;  %v1498_v50 = vsel %vm1296_vm3, %v1490_v47, -inf }
 0x65c   : > { %1499 = vmax.xlane.f32.xlu0 %v1498_v50  ;;  %v2296_v51 = vpop.f32.mrb[7].mxu0  ;;  %v2502_v50 = vld [vmem:[%s3531_s12 + $0x8] sm:$0xff]  }
 0x65d   : > { %v1475_v52 = vpop.f32.mrb[20].mxu1 }
 0x65e   : > { %v1491_v53 = vsel %vm1485_vm4, %v1475_v52, -1e+30  ;;  %v2301_v54 = vpop.f32.mrb[21].mxu1 }
 0x65f   : > { %1252 = vrot.lane.b32.xlu1 %v3363_v34, %s2823_s22  ;;  %v1478_v55 = vpop.f32.mrb[22].mxu1  ;;  %v1501_v56 = vsel %vm1296_vm3, %v1491_v53, -inf  ;;  %s2829_s22 = smov 24  }
 0x660   : > { %1502 = vmax.xlane.f32.xlu0 %v1501_v56  ;;  %v2302_v57 = vpop.f32.mrb[23].mxu1 }
 0x669   : > { %v1494_v58 = vpop.xlane.xlu0 %1493 }
 0x66a   : > { %v1504_v59 = vsub.f32 %v1488_v29, %v1494_v58 }
 0x66c   : > { %v1508_v60 = vmul.f32 1.442695, %v1504_v59 }
 0x66e   : > { %2525 = vpow2.f32 %v1508_v60 }
 0x678   : > { %v2526_v61 = vpop.eup %2525 }
 0x679   : > { %v1516_v62 = vsel %vm1296_vm3, %v2526_v61, 0.0 }
 0x683   : > { %1517 = vadd.xlane.f32.xlu1 %v1516_v62 }
 0x6db   : > { %v1497_v63 = vpop.xlane.xlu1 %1496 }
 0x6dc   : > { %v1505_v0 = vsub.f32 %v1489_v41, %v1497_v63 }
 0x6de   : > { %v1510_v1 = vmul.f32 1.442695, %v1505_v0 }
 0x6df   : > { %v1253_v2 = vpop.permute.xlu1 %1252 }
 0x6e0   : > { %2527 = vpow2.f32 %v1510_v1  ;;  %v1262_v7 = vpack.c.bf16 %v1253_v2, %v1253_v2 }
 0x6e2   : > { %v1591_v4 = vsel %vm1543_vm5, %v1262_v7, 0 }
 0x6e3   : > { %2310 = vmatpush3.bf16.msra.mxu1 %v1591_v4 }
 0x6e4   : > { %2321 = vmatprep.subr.bf16.mxu1 %v2820_v27 }
 0x6e9   : > { %v1500_v3 = vpop.xlane.xlu0 %1499 }
 0x6ea   : > { %v2528_v5 = vpop.eup %2527  ;;  %v1506_v9 = vsub.f32 %v1490_v47, %v1500_v3  ;;  %v2501_v47 = vld [vmem:[%s3531_s12] sm:$0xff]  }
 0x6eb   : > { %v1519_v10 = vsel %vm1296_vm3, %v2528_v5, 0.0 }
 0x6ec   : > { %v1512_v11 = vmul.f32 1.442695, %v1506_v9  ;;  %1520 = vadd.xlane.f32.xlu0 %v1519_v10 }
 0x6ed   : > { %v1503_v13 = vpop.xlane.xlu0 %1502 }
 0x6ee   : > { %2529 = vpow2.f32 %v1512_v11  ;;  %v1507_v14 = vsub.f32 %v1491_v53, %v1503_v13  ;;  %v2503_v11 = vld [vmem:[%s3533_s14] sm:$0xff]   ;;  %v2504_v13 = vld [vmem:[%s3533_s14 + $0x8] sm:$0xff]  }
 0x6f0   : > { %v1514_v15 = vmul.f32 1.442695, %v1507_v14  ;;  %v2506_v14 = vld [vmem:[%s3587_s15 + $0x8] sm:$0xff]  }
 0x6f2   : > { %2531 = vpow2.f32 %v1514_v15  ;;  %v2507_v15 = vld [vmem:[%s3587_s15 + $0x10] sm:$0xff]  }
 0x6f8   : > { %v2530_v17 = vpop.eup %2529 }
 0x6f9   : > { %v1522_v18 = vsel %vm1296_vm3, %v2530_v17, 0.0 }
 0x6fa   : > { %1523 = vadd.xlane.f32.xlu1 %v1522_v18 }
 0x6fc   : > { %v2532_v19 = vpop.eup %2531 }
 0x6fd   : > { %v1525_v20 = vsel %vm1296_vm3, %v2532_v19, 0.0 }
 0x6fe   : > { %1526 = vadd.xlane.f32.xlu0 %v1525_v20 }
 0x70b   : > { %1258 = vrot.lane.b32.xlu1 %v3363_v34, %s2826_s20 }
 0x710   : > { %v1518_v21 = vpop.xlane.xlu1 %1517 }
 0x711   : > { %2533 = vrcp.f32 %v1518_v21 }
 0x714   : > { %1255 = vrot.lane.b32.xlu0 %v3363_v34, %s2825_s24 }
 0x71b   : > { %v2534_v22 = vpop.eup %2533 }
 0x71c   : > { %v1532_v8 = vmul.f32 %v2534_v22, %v2526_v61 }
 0x71e   : > { %v1536_v23 = vpack.c.bf16 %v1532_v8, %v1532_v8 }
 0x720   : > { %2306 = vmatmul.mubr.msk.bf16.vlgmr.msra.gmra.mrb[8].mxu0 %vm1296_vm3, %v1536_v23 }
 0x721   : > { %2317 = vmatprep.mubr.msk.bf16.mxu0 %vm2821_vm1, %v2820_v27 }
 0x779   : > { %v1521_v24 = vpop.xlane.xlu0 %1520 }
 0x77a   : > { %2535 = vrcp.f32 %v1521_v24  ;;  %v2508_v24 = vld [vmem:[%s3587_s15 + $0x18] sm:$0xff]  }
 0x784   : > { %v2536_v25 = vpop.eup %2535 }
 0x785   : > { %v1533_v16 = vmul.f32 %v2536_v25, %v2528_v5  ;;  %v2509_v25 = vld [vmem:[%s3587_s15 + $0x20] sm:$0xff]  }
 0x787   : > { %v1524_v26 = vpop.xlane.xlu1 %1523  ;;  %v1537_v28 = vpack.c.bf16 %v1533_v16, %v1533_v16  ;;  %v2510_v16 = vld [vmem:[%s3587_s15 + $0x28] sm:$0xff]  }
 0x788   : > { %2537 = vrcp.f32 %v1524_v26  ;;  %v2511_v26 = vld [vmem:[%s3587_s15 + $0x30] sm:$0xff]  }
 0x789   : > { %2312 = vmatmul.mubr.msk.bf16.vlgmr.msra.gmra.mrb[24].mxu1 %vm1296_vm3, %v1537_v28  ;;  %v2512_v28 = vld [vmem:[%s3587_s15 + $0x38] sm:$0xff]  }
 0x78a   : > { %2323 = vmatprep.mubr.msk.bf16.mxu1 %vm2821_vm1, %v2820_v27 }
 0x78b   : > { %v1259_v12 = vpop.permute.xlu1 %1258  ;;  %v1527_v29 = vpop.xlane.xlu0 %1526 }
 0x78c   : > { %v1264_v30 = vpack.c.bf16 %v1259_v12, %v1259_v12  ;;  %2539 = vrcp.f32 %v1527_v29 }
 0x78e   : > { %v1683_v31 = vsel %vm1543_vm5, %v1264_v30, 0 }
 0x78f   : > { %2322 = vmatpush3.bf16.msra.mxu1 %v1683_v31  ;;  %v1256_v32 = vpop.permute.xlu0 %1255 }
 0x790   : > { %v1263_v33 = vpack.c.bf16 %v1256_v32, %v1256_v32  ;;  %2335 = vmatprep.subr.bf16.mxu1 %v2820_v27 }
 0x792   : > { %v2538_v34 = vpop.eup %2537  ;;  %v1637_v35 = vsel %vm1543_vm5, %v1263_v33, 0 }
 0x793   : > { %v1534_v36 = vmul.f32 %v2538_v34, %v2530_v17  ;;  %2316 = vmatpush3.bf16.msra.mxu0 %v1637_v35 }
 0x794   : > { %2327 = vmatprep.subr.bf16.mxu0 %v2820_v27 }
 0x795   : > { %v1538_v37 = vpack.c.bf16 %v1534_v36, %v1534_v36 }
 0x796   : > { %v2540_v38 = vpop.eup %2539 }
 0x797   : > { %v1535_v39 = vmul.f32 %v2540_v38, %v2532_v19  ;;  %2318 = vmatmul.mubr.msk.bf16.vlgmr.msra.gmra.mrb[12].mxu0 %vm1296_vm3, %v1538_v37 }
 0x798   : > { %2331 = vmatprep.mubr.msk.bf16.mxu0 %vm2821_vm1, %v2820_v27  ;;  %2328 = vmatpush3.bf16.msra.mxu0 %v2501_v47 }
 0x799   : > { %v1539_v40 = vpack.c.bf16 %v1535_v39, %v1535_v39  ;;  %2329 = vmatprep.subr.bf16.mxu0 %v2820_v27  ;;  %v2190_v39 = vld [vmem:[%s3590_s16] ss:$0 sm:$0xff] }
 0x79b   : > { %2324 = vmatmul.mubr.msk.bf16.vlgmr.msra.gmra.mrb[28].mxu1 %vm1296_vm3, %v1539_v40 }
 0x79c   : > { %2339 = vmatprep.mubr.msk.bf16.mxu1 %vm2821_vm1, %v2820_v27  ;;  %2330 = vmatpush3.bf16.msra.mxu0 %v2502_v50 }
 0x79d   : > { %2343 = vmatprep.subr.bf16.mxu0 %v2820_v27  ;;  %2336 = vmatpush3.bf16.msra.mxu1 %v2503_v11 }
 0x79e   : > { %2337 = vmatprep.subr.bf16.mxu1 %v2820_v27 }
 0x7a1   : > { %2338 = vmatpush3.bf16.msra.mxu1 %v2504_v13 }
 0x7f3   : > { %v1581_v41 = vpop.f32.mrb[8].mxu0 }
 0x7f4   : > { %v2307_v42 = vpop.f32.mrb[9].mxu0 }
 0x7f5   : > { %v1584_v43 = vpop.f32.mrb[10].mxu0 }
 0x7f6   : > { %v2308_v44 = vpop.f32.mrb[11].mxu0 }
 0x85c   : > { %v1627_v45 = vpop.f32.mrb[24].mxu1 }
 0x85d   : > { %1726 = vrot.lane.b32.xlu1 %v1627_v45, %s2827_s23  ;;  %v2313_v46 = vpop.f32.mrb[25].mxu1  ;;  %s703_s23 = scalar_lea.vmem [#allocation16], %s2148_s19  ;;  %s2830_s19 = smov [#allocation16]  }
 0x85e   : > { %v1630_v48 = vpop.f32.mrb[26].mxu1  ;;  %s1992_s4 = sshll.u32 %s703_s23, 4  ;;  %s2730_s24 = sshll.u32 %s2830_s19, 4  ;;  %s3476_s4 = int_to_ptr.vmem [resolvable:$true] %s1992_s4  ;;  %s2731_s24 = int_to_ptr.vmem [resolvable:$false] %s2730_s24 }
 0x85f   : > { %v2314_v49 = vpop.f32.mrb[27].mxu1  ;;  %s2732_s20 = scalar_lea.vmem %s2731_s24, 256  ;;  %p2733_p4 = scmp.lt.s32.totalorder %s3476_s4, %s2731_s24 }
 0x86a   : > { %v1673_v51 = vpop.f32.mrb[12].mxu0 }
 0x86b   : > { %1730 = vrot.lane.b32.xlu0 %v1673_v51, %s2828_s18  ;;  %v2319_v52 = vpop.f32.mrb[13].mxu0  ;;  %s3474_s18 = scalar_lea.hbm %s3592_s13, %s2200_s25 }
 0x86c   : > { %v1676_v53 = vpop.f32.mrb[14].mxu0 }
 0x86d   : > { %v2320_v54 = vpop.f32.mrb[15].mxu0 }
 0x86e   : > { %v1719_v55 = vpop.f32.mrb[28].mxu1 }
 0x86f   : > { %1734 = vrot.lane.b32.xlu1 %v1719_v55, %s2829_s22  ;;  %v2325_v56 = vpop.f32.mrb[29].mxu1  ;;  %s3588_s22 = sld [smem:[#allocation32_spill]] }
 0x870   : > { %v1722_v57 = vpop.f32.mrb[30].mxu1 }
 0x871   : > { %v2326_v58 = vpop.f32.mrb[31].mxu1 }
 0x875   : > { %v2185_v21 = vld [vmem:[%s3588_s22] ss:$0 sm:$0xff]  ;;  %s3589_s22 = sld [smem:[#allocation33_spill]] }
 0x87b   : > { %v2186_v12 = vld [vmem:[%s3589_s22] ss:$0 sm:$0xff]  ;;  %s2726_s22 = scalar_lea.vmem %s3476_s4, 128 }
 0x87c   : > { %p2727_p10 = scmp.ne.s32.totalorder %s3476_s4, %s2726_s22  ;;  %p2734_p7 = scmp.lt.s32.totalorder %s2732_s20, %s2726_s22 }
 0x87e   : > { %p2728_p0 = pnand %p2727_p10, %p3593_p12  ;;  %p2735_p8 = por %p2734_p7, %p2733_p4 }
 0x880   : > { %p2729_p2 = pneg %p2728_p0 }
 0x882   : > { %p2736_p9 = pnand %p2735_p8, %p2729_p2 }
 0x8cf   : > { %v1727_v59 = vpop.permute.xlu1 %1726 }
 0x8d0   : > { %v1737_v61 = vsel %vm1296_vm3, %v1581_v41, %v1727_v59 }
 0x8dd   : > { %v1731_v60 = vpop.permute.xlu0 %1730 }
 0x8de   : > { %v1739_v62 = vsel %vm1738_vm6, %v1737_v61, %v1731_v60 }
 0x8e1   : > { %v1735_v63 = vpop.permute.xlu1 %1734 }
 0x8e2   : > { %v1741_v0 = vsel %vm1740_vm7, %v1739_v62, %v1735_v63 }
 0x8e3   : > { %v1742_v1 = vpack.c.bf16 %v1741_v0, %v1741_v0 }
 0x8e5   : > { %2332 = vmatmul.mubr.msk.bf16.vlgmr.msra.gmra.mrb[16].mxu0 %vm712_vm0, %v1742_v1 }
 0x8e6   : > { %2359 = vmatprep.mubr.msk.bf16.mxu0 %vm2821_vm1, %v2820_v27 }
 0x9b8   : > { %v3415_v2 = vpop.f32.mrb[16].mxu0 }
 0x9b9   : > { %v1798_v7 = vadd.f32 %v3415_v2, %v3214_v6  ;;  %v2333_v4 = vpop.f32.mrb[17].mxu0  ;;  %v2505_v6 = vld [vmem:[%s3587_s15] sm:$0xff]  }
 0x9ba   : > { %v1795_v3 = vpop.f32.mrb[18].mxu0  ;;  %2344 = vmatpush3.bf16.msra.mxu0 %v2505_v6 }
 0x9bb   : > { %v2334_v5 = vpop.f32.mrb[19].mxu0  ;;  %v1799_v9 = vmul.f32 %v1798_v7, %v1798_v7  ;;  %2345 = vmatprep.subr.bf16.mxu0 %v2820_v27 }
 0x9bd   : > { %v1800_v10 = vsel %vm712_vm0, %v1799_v9, 0.0 }
 0x9be   : > { %1801 = vadd.xlane.f32.xlu0 %v1800_v10  ;;  %2346 = vmatpush3.bf16.msra.mxu0 %v2506_v14 }
 0x9bf   : > { %2347 = vmatprep.subr.bf16.mxu0 %v2820_v27 }
 0x9c2   : > { %2348 = vmatpush3.bf16.msra.mxu0 %v2507_v15 }
 0x9c3   : > { %2349 = vmatprep.subr.bf16.mxu0 %v2820_v27 }
 0x9c6   : > { %2350 = vmatpush3.bf16.msra.mxu0 %v2508_v24 }
 0x9c7   : > { %2351 = vmatprep.subr.bf16.mxu0 %v2820_v27 }
 0x9ca   : > { %2352 = vmatpush3.bf16.msra.mxu0 %v2509_v25 }
 0x9cb   : > { %2353 = vmatprep.subr.bf16.mxu0 %v2820_v27 }
 0x9ce   : > { %2354 = vmatpush3.bf16.msra.mxu0 %v2510_v16 }
 0x9cf   : > { %2355 = vmatprep.subr.bf16.mxu0 %v2820_v27 }
 0x9d2   : > { %2356 = vmatpush3.bf16.msra.mxu0 %v2511_v26 }
 0x9d3   : > { %2357 = vmatprep.subr.bf16.mxu0 %v2820_v27 }
 0x9d6   : > { %2358 = vmatpush3.bf16.msra.mxu0 %v2512_v28 }
 0xa4b   : > { %v1802_v17 = vpop.xlane.xlu0 %1801 }
 0xa4c   : > { %v1803_v18 = vmul.f32 0.03125, %v1802_v17 }
 0xa4e   : > { %v1804_v19 = vadd.f32 1.1920929e-07, %v1803_v18 }
 0xa50   : > { %2541 = vrsqrt.f32 %v1804_v19 }
 0xa5a   : > { %v2542_v20 = vpop.eup %2541 }
 0xa5b   : > { %v1806_v22 = vmul.f32 %v2542_v20, %v1798_v7 }
 0xa5d   : > { %v1813_v8 = vmul.f32 %v2185_v21, %v1806_v22 }
 0xa5f   : > { %v1814_v23 = vpack.c.bf16 %v1813_v8, %v1813_v8 }
 0xa61   : > { %2340 = vmatmul.mubr.msk.bf16.vlgmr.msra.gmra.mrb[32].mxu1 %vm712_vm0, %v1814_v23 }
 0xb34   : > { %v1870_v29 = vpop.f32.mrb[32].mxu1 }
 0xb35   : > { %v1871_v30 = vadd.f32 %v2186_v12, %v1870_v29  ;;  %v2341_v31 = vpop.f32.mrb[33].mxu1 }
 0xb36   : > { %v1873_v32 = vpop.f32.mrb[34].mxu1 }
 0xb37   : > { %v1877_v33 = vmul.f32 0.70710677, %v1871_v30  ;;  %v2342_v34 = vpop.f32.mrb[35].mxu1  ;;  %v1876_v27 = vmul.f32 0.5, %v1871_v30 }
 0xb39   : > { %2543 = verf.f32 %v1877_v33 }
 0xb43   : > { %v2544_v35 = vpop.eup %2543 }
 0xb44   : > { %v1879_v36 = vadd.f32 1.0, %v2544_v35 }
 0xb46   : > { %v1880_v37 = vmul.f32 %v1879_v36, %v1876_v27 }
 0xb48   : > { %v1881_v38 = vpack.c.bf16 %v1880_v37, %v1880_v37 }
 0xb4a   : > { %2360 = vmatmul.mubr.bf16.vlgmr.msra.gmra.mrb[20].mxu0 %v1881_v38 }
 0xc1d   : > { %v1970_v40 = vpop.f32.mrb[20].mxu0 }
 0xc1e   : > { %v1971_v41 = vadd.f32 %v2190_v39, %v1970_v40  ;;  %v2361_v42 = vpop.f32.mrb[21].mxu0 }
 0xc1f   : > { %v1973_v43 = vpop.f32.mrb[22].mxu0 }
 0xc20   : > { %v1976_v44 = vadd.f32 %v1971_v41, %v3415_v2  ;;  %v2362_v45 = vpop.f32.mrb[23].mxu0 }
 0xc22   : > { %1977 = vst.msk [vmem:[%s703_s23] sm:$0xff] %vm712_vm0, %v1976_v44 }
 0xc23   : > { %2739 = shalt.err (!%p2736_p9)
}
 0xc24   : > { %s2740_s2 = scalar_lea.hbm %s3474_s18, 128  ;;  %s2744_s23 = scalar_lea.hbm %s3592_s13, 256 }
 0xc25   : > { %p2741_p13 = scmp.ne.s32.totalorder %s3474_s18, %s2740_s2  ;;  %p2745_p6 = scmp.lt.u32.totalorder %s3474_s18, %s3592_s13 }
 0xc26   : > { %p2746_p5 = scmp.lt.u32.totalorder %s2744_s23, %s2740_s2  ;;  %p2748_p0 = scmp.lt.u32.totalorder %s2740_s2, %s3474_s18 }
 0xc27   : > { %p2742_p1 = pnand %p2741_p13, %p3593_p12 }
 0xc28   : > { %p2747_p10 = por %p2746_p5, %p2745_p6 }
 0xc29   : > { %p2743_p3 = pneg %p2742_p1 }
 0xc2a   : > { %p2749_p2 = por %p2748_p0, %p2747_p10 }
 0xc2c   : > { %p2750_p4 = pnand %p2749_p2, %p2743_p3 }
 0xc2e   : > { %2753 = shalt.err (!%p2750_p4)
}
 0xc2f   : > { %2393 = dma.vmem_to_hbm [thread:$0]  (%p3593_p12), %s3476_s4, 128, %s3474_s18, %s1979_s0  }
 0xc30 PF: > { %s3594_s22 = sld [smem:[#allocation23_spill]]  ;;  %s3595_s19 = sld [smem:[#allocation27_spill]] }
 0xc36   : > { %s2004_s24 = sand.u32 1, %s3594_s22   ;;  %p3596_p7 = scmp.ne.s32.totalorder %s3595_s19, 0 }
 0xc37   : > { %s2005_s20 = scalar_lea.sflag [#allocation5], %s2004_s24 }
 0xc38   : > { %p2418_p8 = pnand %p2138_p11, %p3596_p7 }
 0xc3a   : > { %2791 = dma.done.wait (!%p2418_p8), %s2005_s20, 128  }
 0xc3b   : > { %2793 = vsyncadd (!%p2418_p8), %s2005_s20, 4294967168  ;;  %s3597_s30 = sld [smem:[#allocation24_spill]]  ;;  %s3598_s2 = sld [smem:[#allocation25_spill]] }
 0xc3c   : > { %s3599_s27 = smov %s2800_s28  ;;  %s3600_s28 = smov %s2804_s29 }
 0xc41   : > { %p33_p9 = scmp.ge.s32.totalorder %s3597_s30, 4   ;;  %s3601_s29 = smov %s3598_s2 }
 0xc43   :  { %35 = sbr.rel (!%p33_p9) target bundleno = 18 (0x12), region = 200 }
 0xc4a   :  { %2010 = vsyncpa [#allocation4], 1 }
 0xc4b   :  { %2012 = vsyncpa [#allocation4 + $0x1], 1 }
 0xc4c   :  { %2013 = vsyncpa [#allocation9], 1 }
 0xc4d   :  { %2014 = vsyncpa [#allocation12], 1 }
 0xc4e   :  { %2015 = vsyncpa [#allocation15], 1 }
 0xc4f   :  { %2016 = vsyncpa [#allocation5], 1 }
 0xc50   :  { %2018 = vsyncpa [#allocation5 + $0x1], 1 }
 0xc51   :  { %2019 = vsyncpa [#allocation6], 1 }
 0xc52   :  { %2021 = vsyncpa [#allocation6 + $0x1], 1 }

</bundles_post_ra>
